<compile_context>
chip_gen: v6e
topology: v6e:2x2x1
jax: 0.10.0
libtpu: 0.0.40
codegen_flags: <defaults>
</compile_context>

<pallas_src>
import math

import jax
import jax.numpy as jnp
from jax.experimental import pallas as pl
from jax.experimental.pallas import tpu as pltpu


def critic_kernel(x_ref, w1_ref, b1_ref, w2_ref, b2_ref, w3_ref, b3_ref, out_ref):
    # One batch tile, batch on lanes:
    #   h1 = relu(W1 @ x + b1); h2 = relu(W2 @ h1 + b2); v = w3 . h2 + b3
    x = x_ref[...].astype(jnp.bfloat16)                                       # (K, tb)

    h1 = jnp.dot(w1_ref[...], x, preferred_element_type=jnp.float32) + b1_ref[...]
    h1 = jnp.maximum(h1, 0.0).astype(jnp.bfloat16)                            # (H, tb)

    h2 = jnp.dot(w2_ref[...], h1, preferred_element_type=jnp.float32) + b2_ref[...]
    h2 = jnp.maximum(h2, 0.0)                                                 # (H, tb) f32

    # fc3 as VPU multiply + sublane reduce (no 1-wide MXU pass); result (1, tb)
    # is already lane-dense, so the store below is a plain unmasked vst.
    v = jnp.sum(h2 * w3_ref[...].astype(jnp.float32), axis=0, keepdims=True)  # (1, tb)
    out_ref[...] = (v + b3_ref[...]).astype(out_ref.dtype)


def critic_forward(a, s, params, *, block_b=1024, min_tiles=1):
    """a: (B, a_dim) f32, s: (B, s_dim) f32.  Returns V: (B, 1) f32.

    block_b:   max rows per grid step (VMEM cap; ~5 MB of activations at 1024).
    min_tiles: set to 2 on v7x for large batches so the "parallel" grid axis
               shards one big tile onto each TensorCore.
    """
    w1, b1, w2, b2, w3, b3 = params
    B = a.shape[0]
    H, K = w1.shape  # hidden (lane-padded, 384) and fused input dim (a_dim+s_dim)

    # Fused concat (torch.cat([a, s], 1)) once in the wrapper; tiny for XLA.
    x = jnp.concatenate([a, s], axis=1)                    # (B, K)

    # As few grid steps as possible (per-step overhead ~0.35 us dominates the
    # tens-of-ns of MXU work at small tiles). Tiles are near-equal and rounded
    # to 128 lanes so padding waste stays small for awkward B.
    n_tiles = -(-B // block_b)
    if min_tiles > 1 and B >= 128 * min_tiles:
        n_tiles = max(n_tiles, min_tiles)

    if n_tiles == 1:
        tb = B                                             # full-array block: always legal
        b_pad = B
    else:
        tb = -(-B // n_tiles)
        tb = -(-tb // 128) * 128                           # lane-dense tiles
        b_pad = n_tiles * tb

    xt = x.T                                               # (K, B)  batch on lanes
    if b_pad != B:
        xt = jnp.pad(xt, ((0, 0), (0, b_pad - B)))

    resident = lambda shape: pl.BlockSpec(shape, lambda i: (0, 0))   # weights/biases
    batched = lambda shape: pl.BlockSpec(shape, lambda i: (0, i))    # per-batch tile

    flops = 2 * b_pad * (K * H + H * H + H)
    bytes_accessed = ((K * H + H * H + H) * 2              # bf16 weights (VMEM-resident)
                      + (2 * H + 1) * 4                    # f32 biases
                      + b_pad * (K + 1) * 4)               # f32 activations in/out

    out = pl.pallas_call(
        critic_kernel,
        out_shape=jax.ShapeDtypeStruct((1, b_pad), jnp.float32),
        grid_spec=pltpu.PrefetchScalarGridSpec(
            num_scalar_prefetch=0,
            grid=(n_tiles,),
            in_specs=[
                batched((K, tb)),       # x^T tile
                resident((H, K)),       # W1  (bf16)
                resident((H, 1)),       # b1  (f32)
                resident((H, H)),       # W2  (bf16)
                resident((H, 1)),       # b2  (f32)
                resident((H, 1)),       # w3 column (bf16)
                resident((1, 1)),       # b3  (f32)
            ],
            out_specs=batched((1, tb)),
        ),
        compiler_params=pltpu.CompilerParams(
            dimension_semantics=("parallel",),
            vmem_limit_bytes=32 * 1024 * 1024),
        cost_estimate=pl.CostEstimate(
            flops=flops, transcendentals=0, bytes_accessed=bytes_accessed),
    )(xt, w1, b1, w2, b2, w3, b3)

    return out[0, :B].reshape(B, 1)


def init_critic_params(key, a_dim, s_dim, hidden=300, hidden_pad=384):
    """PyTorch nn.Linear default init: U(-1/sqrt(fan_in), 1/sqrt(fan_in)).
    Weights kept in the PyTorch (out, in) layout (matches the transposed
    kernel), zero-padded on the hidden axis to `hidden_pad`, stored bf16.
    Biases stay float32 column vectors. Zero padding is exact: padded hidden
    units are relu(0) = 0 and their outgoing weights are 0."""
    def linear(k, fan_in, fan_out):
        kw, kb = jax.random.split(k)
        bound = 1.0 / math.sqrt(fan_in)
        w = jax.random.uniform(kw, (fan_out, fan_in), jnp.float32, -bound, bound)
        b = jax.random.uniform(kb, (fan_out, 1), jnp.float32, -bound, bound)
        return w, b

    k1, k2, k3 = jax.random.split(key, 3)
    w1, b1 = linear(k1, a_dim + s_dim, hidden)     # (300, K), (300, 1)
    w2, b2 = linear(k2, hidden, hidden)            # (300, 300), (300, 1)
    w3, b3 = linear(k3, hidden, 1)                 # (1, 300), (1, 1)

    p = hidden_pad - hidden
    w1p = jnp.pad(w1, ((0, p), (0, 0))).astype(jnp.bfloat16)      # (H, K)
    b1p = jnp.pad(b1, ((0, p), (0, 0)))                           # (H, 1) f32
    w2p = jnp.pad(w2, ((0, p), (0, p))).astype(jnp.bfloat16)      # (H, H)
    b2p = jnp.pad(b2, ((0, p), (0, 0)))                           # (H, 1) f32
    w3p = jnp.pad(w3.T, ((0, p), (0, 0))).astype(jnp.bfloat16)    # (H, 1)
    return (w1p, b1p, w2p, b2p, w3p, b3)


def _reference(a, s, params):
    """Same math in plain JAX (bf16 weights/activations, f32 accumulation)."""
    w1, b1, w2, b2, w3, b3 = params
    xt = jnp.concatenate([a, s], axis=1).T.astype(jnp.bfloat16)
    h1 = jnp.maximum(jnp.dot(w1, xt, preferred_element_type=jnp.float32) + b1, 0.0)
    h1 = h1.astype(jnp.bfloat16)
    h2 = jnp.maximum(jnp.dot(w2, h1, preferred_element_type=jnp.float32) + b2, 0.0)
    v = jnp.sum(h2 * w3.astype(jnp.float32), axis=0, keepdims=True) + b3
    return v.T                                     # (B, 1)


if __name__ == "__main__":
    a_dim, s_dim = 4, 12
    batch = 2

    key = jax.random.PRNGKey(0)
    k_a, k_s, k_p, k_a2, k_s2 = jax.random.split(key, 5)

    params = init_critic_params(k_p, a_dim, s_dim)

    # Small batch: single full-array tile (grid = 1).
    a = jax.random.normal(k_a, (batch, a_dim), jnp.float32)
    s = jax.random.normal(k_s, (batch, s_dim), jnp.float32)
    v = jax.block_until_ready(critic_forward(a, s, params))
    assert v.shape == (batch, 1)
    assert jnp.allclose(v, _reference(a, s, params), atol=5e-3, rtol=5e-3), \
        "small-batch mismatch vs reference"

    # Larger batch forced through the multi-tile path (padding + lane-dense
    # per-tile output blocks + "parallel" grid axis).
    big_b = 300
    a2 = jax.random.normal(k_a2, (big_b, a_dim), jnp.float32)
    s2 = jax.random.normal(k_s2, (big_b, s_dim), jnp.float32)
    v2 = jax.block_until_ready(critic_forward(a2, s2, params, block_b=128))
    assert v2.shape == (big_b, 1)
    assert jnp.allclose(v2, _reference(a2, s2, params), atol=5e-3, rtol=5e-3), \
        "multi-tile mismatch vs reference"

    print("KERNEL_OK")
</pallas_src>

<mosaic_0001>
module attributes {stable_mosaic.version = 11 : i64} {
  func.func @critic_kernel(%arg0: i32, %arg1: memref<16x2xf32, #tpu.memory_space<vmem>>, %arg2: memref<384x16xbf16, #tpu.memory_space<vmem>>, %arg3: memref<384x1xf32, #tpu.memory_space<vmem>>, %arg4: memref<384x384xbf16, #tpu.memory_space<vmem>>, %arg5: memref<384x1xf32, #tpu.memory_space<vmem>>, %arg6: memref<384x1xbf16, #tpu.memory_space<vmem>>, %arg7: memref<1x1xf32, #tpu.memory_space<vmem>>, %arg8: memref<1x2xf32, #tpu.memory_space<vmem>>) attributes {dimension_semantics = [#tpu.dimension_semantics<parallel>], iteration_bounds = array<i64: 1>, scalar_prefetch = 0 : i64, scratch_operands = 0 : i64, tpu.core_type = #tpu.core_type<tc>, window_params = [{transform_indices = @transform_0, window_bounds = array<i64: 16, 2>}, {pipeline_mode = #tpu.pipeline_mode<synchronous>, transform_indices = @transform_1, window_bounds = array<i64: 384, 16>}, {pipeline_mode = #tpu.pipeline_mode<synchronous>, transform_indices = @transform_2, window_bounds = array<i64: 384, 1>}, {pipeline_mode = #tpu.pipeline_mode<synchronous>, transform_indices = @transform_3, window_bounds = array<i64: 384, 384>}, {pipeline_mode = #tpu.pipeline_mode<synchronous>, transform_indices = @transform_4, window_bounds = array<i64: 384, 1>}, {pipeline_mode = #tpu.pipeline_mode<synchronous>, transform_indices = @transform_5, window_bounds = array<i64: 384, 1>}, {pipeline_mode = #tpu.pipeline_mode<synchronous>, transform_indices = @transform_6, window_bounds = array<i64: 1, 1>}, {transform_indices = @transform_7, window_bounds = array<i64: 1, 2>}]} {
    %c0 = arith.constant 0 : index
    %c0_0 = arith.constant 0 : index
    %0 = vector.load %arg1[%c0, %c0_0] : memref<16x2xf32, #tpu.memory_space<vmem>>, vector<16x2xf32>
    %1 = arith.truncf %0 : vector<16x2xf32> to vector<16x2xbf16>
    %c0_1 = arith.constant 0 : index
    %c0_2 = arith.constant 0 : index
    %2 = vector.load %arg2[%c0_1, %c0_2] : memref<384x16xbf16, #tpu.memory_space<vmem>>, vector<384x16xbf16>
    %cst = arith.constant dense<0.000000e+00> : vector<384x2xf32>
    %3 = tpu.matmul %2, %1, %cst {dimension_numbers = #tpu.dot_dimension_numbers<[1], [0], [0], [1], [0, 0, 1, 1], [], []>} : vector<384x16xbf16>, vector<16x2xbf16>, vector<384x2xf32> -> vector<384x2xf32>
    %c0_3 = arith.constant 0 : index
    %c0_4 = arith.constant 0 : index
    %4 = vector.load %arg3[%c0_3, %c0_4] : memref<384x1xf32, #tpu.memory_space<vmem>>, vector<384x1xf32>
    %5 = vector.broadcast %4 : vector<384x1xf32> to vector<384x2xf32>
    %6 = arith.addf %3, %5 : vector<384x2xf32>
    %cst_5 = arith.constant 0.000000e+00 : f32
    %7 = vector.broadcast %cst_5 : f32 to vector<384x2xf32>
    %8 = arith.maximumf %6, %7 : vector<384x2xf32>
    %9 = arith.truncf %8 : vector<384x2xf32> to vector<384x2xbf16>
    %c0_6 = arith.constant 0 : index
    %c0_7 = arith.constant 0 : index
    %10 = vector.load %arg4[%c0_6, %c0_7] : memref<384x384xbf16, #tpu.memory_space<vmem>>, vector<384x384xbf16>
    %cst_8 = arith.constant dense<0.000000e+00> : vector<384x2xf32>
    %11 = tpu.matmul %10, %9, %cst_8 {dimension_numbers = #tpu.dot_dimension_numbers<[1], [0], [0], [1], [0, 0, 1, 1], [], []>} : vector<384x384xbf16>, vector<384x2xbf16>, vector<384x2xf32> -> vector<384x2xf32>
    %c0_9 = arith.constant 0 : index
    %c0_10 = arith.constant 0 : index
    %12 = vector.load %arg5[%c0_9, %c0_10] : memref<384x1xf32, #tpu.memory_space<vmem>>, vector<384x1xf32>
    %13 = vector.broadcast %12 : vector<384x1xf32> to vector<384x2xf32>
    %14 = arith.addf %11, %13 : vector<384x2xf32>
    %cst_11 = arith.constant 0.000000e+00 : f32
    %15 = vector.broadcast %cst_11 : f32 to vector<384x2xf32>
    %16 = arith.maximumf %14, %15 : vector<384x2xf32>
    %c0_12 = arith.constant 0 : index
    %c0_13 = arith.constant 0 : index
    %17 = vector.load %arg6[%c0_12, %c0_13] : memref<384x1xbf16, #tpu.memory_space<vmem>>, vector<384x1xbf16>
    %18 = arith.extf %17 : vector<384x1xbf16> to vector<384x1xf32>
    %19 = vector.broadcast %18 : vector<384x1xf32> to vector<384x2xf32>
    %20 = arith.mulf %16, %19 : vector<384x2xf32>
    %cst_14 = arith.constant dense<0.000000e+00> : vector<2xf32>
    %21 = vector.multi_reduction <add>, %20, %cst_14 [0] : vector<384x2xf32> to vector<2xf32>
    %22 = vector.shape_cast %21 : vector<2xf32> to vector<1x2xf32>
    %c0_15 = arith.constant 0 : index
    %c0_16 = arith.constant 0 : index
    %23 = vector.load %arg7[%c0_15, %c0_16] : memref<1x1xf32, #tpu.memory_space<vmem>>, vector<1x1xf32>
    %24 = vector.broadcast %23 : vector<1x1xf32> to vector<1x2xf32>
    %25 = arith.addf %22, %24 : vector<1x2xf32>
    %c0_17 = arith.constant 0 : index
    %c0_18 = arith.constant 0 : index
    %26 = vector.load %arg8[%c0_17, %c0_18] : memref<1x2xf32, #tpu.memory_space<vmem>>, vector<1x2xf32>
    tpu.vector_store %arg8[%c0_17, %c0_18], %25 {strides = array<i32>} : memref<1x2xf32, #tpu.memory_space<vmem>>, vector<1x2xf32>,
    return
  }
  func.func @transform_0(%arg0: i32) -> (i32, i32) {
    %c0_i32 = arith.constant 0 : i32
    %c0_i32_0 = arith.constant 0 : i32
    return %c0_i32, %arg0 : i32, i32
  }
  func.func @transform_1(%arg0: i32) -> (i32, i32) {
    %c0_i32 = arith.constant 0 : i32
    %c0_i32_0 = arith.constant 0 : i32
    %c0_i32_1 = arith.constant 0 : i32
    return %c0_i32, %c0_i32_0 : i32, i32
  }
  func.func @transform_2(%arg0: i32) -> (i32, i32) {
    %c0_i32 = arith.constant 0 : i32
    %c0_i32_0 = arith.constant 0 : i32
    %c0_i32_1 = arith.constant 0 : i32
    return %c0_i32, %c0_i32_0 : i32, i32
  }
  func.func @transform_3(%arg0: i32) -> (i32, i32) {
    %c0_i32 = arith.constant 0 : i32
    %c0_i32_0 = arith.constant 0 : i32
    %c0_i32_1 = arith.constant 0 : i32
    return %c0_i32, %c0_i32_0 : i32, i32
  }
  func.func @transform_4(%arg0: i32) -> (i32, i32) {
    %c0_i32 = arith.constant 0 : i32
    %c0_i32_0 = arith.constant 0 : i32
    %c0_i32_1 = arith.constant 0 : i32
    return %c0_i32, %c0_i32_0 : i32, i32
  }
  func.func @transform_5(%arg0: i32) -> (i32, i32) {
    %c0_i32 = arith.constant 0 : i32
    %c0_i32_0 = arith.constant 0 : i32
    %c0_i32_1 = arith.constant 0 : i32
    return %c0_i32, %c0_i32_0 : i32, i32
  }
  func.func @transform_6(%arg0: i32) -> (i32, i32) {
    %c0_i32 = arith.constant 0 : i32
    %c0_i32_0 = arith.constant 0 : i32
    %c0_i32_1 = arith.constant 0 : i32
    return %c0_i32, %c0_i32_0 : i32, i32
  }
  func.func @transform_7(%arg0: i32) -> (i32, i32) {
    %c0_i32 = arith.constant 0 : i32
    %c0_i32_0 = arith.constant 0 : i32
    return %c0_i32, %arg0 : i32, i32
  }
}

</mosaic_0001>

<bundles_post_ra>
// kernel: tpu_custom_call.1
= control target key start
LH: loop header
LB: loop body
LE: loop exit
PB: predicated region body
PF: predicated region fallthrough
CT: control target
= control target key end

     0   :  { %s4471_s0 = inlined_call_operand.vmem [shape: f32[16,2], index: 0, kind: input, shape index: {}]   ;;  %s4472_s1 = inlined_call_operand.vmem [shape: bf16[384,16], index: 1, kind: input, shape index: {}]   ;;  %s4473_s2 = inlined_call_operand.vmem [shape: f32[384,1], index: 2, kind: input, shape index: {}]   ;;  %s4474_s3 = inlined_call_operand.vmem [shape: bf16[384,384], index: 3, kind: input, shape index: {}]   ;;  %s4475_s4 = inlined_call_operand.vmem [shape: f32[384,1], index: 4, kind: input, shape index: {}]   ;;  %s4476_s5 = inlined_call_operand.vmem [shape: bf16[384,1], index: 5, kind: input, shape index: {}]   ;;  %s4477_s6 = inlined_call_operand.<no memory space> [shape: f32[1,1], index: 6, kind: input, shape index: {}]   ;;  %s4478_s7 = inlined_call_operand.hbm [shape: f32[1,2], index: 7, kind: output, shape index: {}]  }
   0x1   :  { %v12_v0 = vstv %s4477_s6 }
   0x2   :  { %13 = vst [vmem:[#allocation2] sm:$0x1] %v12_v0 }
   0x3   :  { %v83_v1 = vld [vmem:[%s4473_s2 + $0x10] sm:$0xff]  ;;  %v81_v2 = vld [vmem:[%s4473_s2] sm:$0xff]  ;;  %v3199_v4 = vmov 0   ;;  %v31_v5 = vld [vmem:[%s4471_s0 + $0x8] sm:$0xff]  ;;  %vm489_vm0 = vcmask 130048  }
   0x4   :  { %v30_v3 = vld [vmem:[%s4471_s0] sm:$0xff]  ;;  %3051 = vset.pattern.permute.xlu1 %v3199_v4  ;;  %3050 = vset.pattern.permute.xlu0 %v3199_v4  ;;  %v84_v6 = vld [vmem:[%s4473_s2 + $0x18] sm:$0xff]  ;;  %v82_v9 = vld [vmem:[%s4473_s2 + $0x8] sm:$0xff] }
   0x5   :  { %141 = vperm.xlu1 %3051, %v83_v1   ;;  %131 = vperm.xlu0 %3050, %v81_v2   ;;  %v32_v7 = vpack.c.bf16 %v31_v5, %v30_v3  ;;  %v3057_v8 = vld [vmem:[%s4472_s1] sm:$0xff]   ;;  %v3058_v10 = vld [vmem:[%s4472_s1 + $0x8] sm:$0xff]   ;;  %v3059_v11 = vld [vmem:[%s4472_s1 + $0x10] sm:$0xff]  }
   0x6   :  { %1627 = vmatprep.subr.bf16.mxu1 %v3199_v4  ;;  %2936 = vmatprep.mubr.msk.bf16.mxu0 %vm489_vm0, %v3057_v8  ;;  %v86_v12 = vld [vmem:[%s4473_s2 + $0x28] sm:$0xff]  ;;  %v85_v13 = vld [vmem:[%s4473_s2 + $0x20] sm:$0xff]  ;;  %v88_v14 = vld [vmem:[%s4473_s2 + $0x38] sm:$0xff] }
   0x7   :  { %2934 = vmatprep.subr.bf16.mxu0 %v32_v7  ;;  %v87_v15 = vld [vmem:[%s4473_s2 + $0x30] sm:$0xff]  ;;  %v3060_v16 = vld [vmem:[%s4472_s1 + $0x18] sm:$0xff]   ;;  %v3061_v17 = vld [vmem:[%s4472_s1 + $0x20] sm:$0xff]  }
   0x8   :  { %2935 = vmatpush3.bf16.msra.mxu0 %v32_v7  ;;  %v90_v18 = vld [vmem:[%s4473_s2 + $0x48] sm:$0xff]  ;;  %v89_v19 = vld [vmem:[%s4473_s2 + $0x40] sm:$0xff]  ;;  %v95_v20 = vld [vmem:[%s4473_s2 + $0x70] sm:$0xff] }
   0x9   :  { %146 = vperm.xlu1 %3051, %v84_v6   ;;  %136 = vperm.xlu0 %3050, %v82_v9   ;;  %v91_v21 = vld [vmem:[%s4473_s2 + $0x50] sm:$0xff]  ;;  %v3062_v22 = vld [vmem:[%s4472_s1 + $0x28] sm:$0xff]   ;;  %v93_v24 = vld [vmem:[%s4473_s2 + $0x60] sm:$0xff] }
   0xa   :  { %v3063_v23 = vld [vmem:[%s4472_s1 + $0x30] sm:$0xff]   ;;  %v96_v25 = vld [vmem:[%s4473_s2 + $0x78] sm:$0xff]  ;;  %v94_v27 = vld [vmem:[%s4473_s2 + $0x68] sm:$0xff] }
   0xb   :  { %2937 = vmatmul.mubr.msk.bf16.vlgmr.msra.gmra.mxu0 %vm489_vm0, %v3058_v10  ;;  %v92_v26 = vld [vmem:[%s4473_s2 + $0x58] sm:$0xff]  ;;  %v3065_v29 = vld [vmem:[%s4472_s1 + $0x40] sm:$0xff]   ;;  %v98_v30 = vld [vmem:[%s4473_s2 + $0x88] sm:$0xff] }
   0xc   :  { %2940 = vmatprep.mubr.msk.bf16.mxu0 %vm489_vm0, %v3059_v11  ;;  %v3064_v28 = vld [vmem:[%s4472_s1 + $0x38] sm:$0xff]   ;;  %v97_v31 = vld [vmem:[%s4473_s2 + $0x80] sm:$0xff]  ;;  %v111_v32 = vld [vmem:[%s4473_s2 + $0xf0] sm:$0xff] }
   0xd   :  { %156 = vperm.xlu1 %3051, %v86_v12   ;;  %151 = vperm.xlu0 %3050, %v85_v13   ;;  %v99_v33 = vld [vmem:[%s4473_s2 + $0x90] sm:$0xff]  ;;  %v3066_v34 = vld [vmem:[%s4472_s1 + $0x48] sm:$0xff]   ;;  %v109_v36 = vld [vmem:[%s4473_s2 + $0xe0] sm:$0xff] }
   0xe   :  { %v3067_v35 = vld [vmem:[%s4472_s1 + $0x50] sm:$0xff]   ;;  %v112_v37 = vld [vmem:[%s4473_s2 + $0xf8] sm:$0xff]  ;;  %v110_v39 = vld [vmem:[%s4473_s2 + $0xe8] sm:$0xff] }
   0xf   :  { %v107_v38 = vld [vmem:[%s4473_s2 + $0xd0] sm:$0xff]  ;;  %v3068_v40 = vld [vmem:[%s4472_s1 + $0x58] sm:$0xff]   ;;  %v3069_v41 = vld [vmem:[%s4472_s1 + $0x60] sm:$0xff]  }
  0x10   :  { %v105_v42 = vld [vmem:[%s4473_s2 + $0xc0] sm:$0xff]  ;;  %v108_v43 = vld [vmem:[%s4473_s2 + $0xd8] sm:$0xff]  ;;  %v103_v44 = vld [vmem:[%s4473_s2 + $0xb0] sm:$0xff] }
  0x11   :  { %166 = vperm.xlu1 %3051, %v88_v14   ;;  %161 = vperm.xlu0 %3050, %v87_v15   ;;  %v106_v45 = vld [vmem:[%s4473_s2 + $0xc8] sm:$0xff]  ;;  %v3071_v47 = vld [vmem:[%s4472_s1 + $0x70] sm:$0xff]   ;;  %v101_v48 = vld [vmem:[%s4473_s2 + $0xa0] sm:$0xff] }
  0x12   :  { %v3070_v46 = vld [vmem:[%s4472_s1 + $0x68] sm:$0xff]   ;;  %v104_v49 = vld [vmem:[%s4473_s2 + $0xb8] sm:$0xff]  ;;  %v3073_v53 = vld [vmem:[%s4472_s1 + $0x80] sm:$0xff]  }
  0x13   :  { %2941 = vmatmul.mubr.msk.bf16.gmra.mxu0 %vm489_vm0, %v3060_v16  ;;  %v100_v50 = vld [vmem:[%s4473_s2 + $0x98] sm:$0xff]  ;;  %v102_v51 = vld [vmem:[%s4473_s2 + $0xa8] sm:$0xff]  ;;  %v113_v55 = vld [vmem:[%s4473_s2 + $0x100] sm:$0xff] }
  0x14   :  { %2944 = vmatprep.mubr.msk.bf16.mxu0 %vm489_vm0, %v3061_v17  ;;  %v3072_v52 = vld [vmem:[%s4472_s1 + $0x78] sm:$0xff]   ;;  %v114_v54 = vld [vmem:[%s4473_s2 + $0x108] sm:$0xff]  ;;  %v115_v57 = vld [vmem:[%s4473_s2 + $0x110] sm:$0xff] }
  0x15   :  { %176 = vperm.xlu1 %3051, %v90_v18   ;;  %171 = vperm.xlu0 %3050, %v89_v19   ;;  %v116_v56 = vld [vmem:[%s4473_s2 + $0x118] sm:$0xff]  ;;  %v3074_v58 = vld [vmem:[%s4472_s1 + $0x88] sm:$0xff]   ;;  %v3075_v59 = vld [vmem:[%s4472_s1 + $0x90] sm:$0xff]  }
  0x16   :  { %v118_v60 = vld [vmem:[%s4473_s2 + $0x128] sm:$0xff]  ;;  %v117_v61 = vld [vmem:[%s4473_s2 + $0x120] sm:$0xff]  ;;  %v120_v62 = vld [vmem:[%s4473_s2 + $0x138] sm:$0xff] }
  0x17   :  { %v119_v63 = vld [vmem:[%s4473_s2 + $0x130] sm:$0xff]  ;;  %v3076_v0 = vld [vmem:[%s4472_s1 + $0x98] sm:$0xff]   ;;  %v3077_v1 = vld [vmem:[%s4472_s1 + $0xa0] sm:$0xff]  }
  0x18   :  { %v127_v2 = vld [vmem:[%s4473_s2 + $0x170] sm:$0xff]  ;;  %v121_v3 = vld [vmem:[%s4473_s2 + $0x140] sm:$0xff]  ;;  %v128_v6 = vld [vmem:[%s4473_s2 + $0x178] sm:$0xff] }
  0x19   :  { %201 = vperm.xlu1 %3051, %v95_v20   ;;  %181 = vperm.xlu0 %3050, %v91_v21   ;;  %v125_v5 = vld [vmem:[%s4473_s2 + $0x160] sm:$0xff]  ;;  %v3078_v7 = vld [vmem:[%s4472_s1 + $0xa8] sm:$0xff]   ;;  %v3079_v8 = vld [vmem:[%s4472_s1 + $0xb0] sm:$0xff]  }
  0x1a   :  { %v123_v9 = vld [vmem:[%s4473_s2 + $0x150] sm:$0xff]  ;;  %v126_v10 = vld [vmem:[%s4473_s2 + $0x168] sm:$0xff]  ;;  %v124_v12 = vld [vmem:[%s4473_s2 + $0x158] sm:$0xff] }
  0x1b   :  { %2945 = vmatmul.mubr.msk.bf16.gmra.mxu0 %vm489_vm0, %v3062_v22  ;;  %v122_v11 = vld [vmem:[%s4473_s2 + $0x148] sm:$0xff] }
  0x1c   :  { %2948 = vmatprep.mubr.msk.bf16.mxu0 %vm489_vm0, %v3063_v23 }
  0x1d   :  { %191 = vperm.xlu1 %3051, %v93_v24   ;;  %206 = vperm.xlu0 %3050, %v96_v25  }
  0x21   :  { %186 = vperm.xlu1 %3051, %v92_v26   ;;  %196 = vperm.xlu0 %3050, %v94_v27  }
  0x23   :  { %2949 = vmatmul.mubr.msk.bf16.gmra.mxu0 %vm489_vm0, %v3064_v28 }
  0x24   :  { %2952 = vmatprep.mubr.msk.bf16.mxu0 %vm489_vm0, %v3065_v29 }
  0x25   :  { %216 = vperm.xlu1 %3051, %v98_v30   ;;  %211 = vperm.xlu0 %3050, %v97_v31  }
  0x29   :  { %281 = vperm.xlu1 %3051, %v111_v32   ;;  %221 = vperm.xlu0 %3050, %v99_v33  }
  0x2b   :  { %2953 = vmatmul.mubr.msk.bf16.gmra.mxu0 %vm489_vm0, %v3066_v34 }
  0x2c   :  { %2956 = vmatprep.mubr.msk.bf16.mxu0 %vm489_vm0, %v3067_v35 }
  0x2d   :  { %271 = vperm.xlu1 %3051, %v109_v36   ;;  %286 = vperm.xlu0 %3050, %v112_v37  }
  0x31   :  { %261 = vperm.xlu1 %3051, %v107_v38   ;;  %276 = vperm.xlu0 %3050, %v110_v39  }
  0x33   :  { %2957 = vmatmul.mubr.msk.bf16.gmra.mxu0 %vm489_vm0, %v3068_v40 }
  0x34   :  { %2960 = vmatprep.mubr.msk.bf16.mxu0 %vm489_vm0, %v3069_v41 }
  0x35   :  { %251 = vperm.xlu1 %3051, %v105_v42   ;;  %266 = vperm.xlu0 %3050, %v108_v43  }
  0x39   :  { %241 = vperm.xlu1 %3051, %v103_v44   ;;  %256 = vperm.xlu0 %3050, %v106_v45  }
  0x3b   :  { %2961 = vmatmul.mubr.msk.bf16.gmra.mxu0 %vm489_vm0, %v3070_v46 }
  0x3c   :  { %2964 = vmatprep.mubr.msk.bf16.mxu0 %vm489_vm0, %v3071_v47 }
  0x3d   :  { %231 = vperm.xlu1 %3051, %v101_v48   ;;  %246 = vperm.xlu0 %3050, %v104_v49  }
  0x41   :  { %226 = vperm.xlu1 %3051, %v100_v50   ;;  %236 = vperm.xlu0 %3050, %v102_v51  }
  0x43   :  { %2965 = vmatmul.mubr.msk.bf16.gmra.mxu0 %vm489_vm0, %v3072_v52 }
  0x44   :  { %2968 = vmatprep.mubr.msk.bf16.mxu0 %vm489_vm0, %v3073_v53 }
  0x45   :  { %296 = vperm.xlu1 %3051, %v114_v54   ;;  %291 = vperm.xlu0 %3050, %v113_v55  }
  0x49   :  { %306 = vperm.xlu1 %3051, %v116_v56   ;;  %301 = vperm.xlu0 %3050, %v115_v57  }
  0x4b   :  { %2969 = vmatmul.mubr.msk.bf16.gmra.mxu0 %vm489_vm0, %v3074_v58 }
  0x4c   :  { %2972 = vmatprep.mubr.msk.bf16.mxu0 %vm489_vm0, %v3075_v59 }
  0x4d   :  { %316 = vperm.xlu1 %3051, %v118_v60   ;;  %311 = vperm.xlu0 %3050, %v117_v61  }
  0x51   :  { %326 = vperm.xlu1 %3051, %v120_v62   ;;  %321 = vperm.xlu0 %3050, %v119_v63  }
  0x53   :  { %2973 = vmatmul.mubr.msk.bf16.gmra.mxu0 %vm489_vm0, %v3076_v0 }
  0x54   :  { %2976 = vmatprep.mubr.msk.bf16.mxu0 %vm489_vm0, %v3077_v1 }
  0x55   :  { %361 = vperm.xlu1 %3051, %v127_v2   ;;  %331 = vperm.xlu0 %3050, %v121_v3  }
  0x59   :  { %351 = vperm.xlu1 %3051, %v125_v5   ;;  %366 = vperm.xlu0 %3050, %v128_v6  }
  0x5b   :  { %2977 = vmatmul.mubr.msk.bf16.gmra.mxu0 %vm489_vm0, %v3078_v7 }
  0x5c   :  { %2980 = vmatprep.mubr.msk.bf16.mxu0 %vm489_vm0, %v3079_v8 }
  0x5d   :  { %341 = vperm.xlu1 %3051, %v123_v9   ;;  %356 = vperm.xlu0 %3050, %v126_v10  }
  0x5e   :  { %14 = vsyncpa [#allocation4], 0  ;;  %v3080_v13 = vld [vmem:[%s4472_s1 + $0xb8] sm:$0xff]   ;;  %v956_v14 = vld [vmem:[%s4475_s4 + $0x8] sm:$0xff]  ;;  %vm2509_vm1 = vcmask 15360   ;;  %vm2622_vm2 = vcmask 8192  }
  0x5f   :  { %v955_v15 = vld [vmem:[%s4475_s4] sm:$0xff]  ;;  %v958_v16 = vld [vmem:[%s4475_s4 + $0x18] sm:$0xff]  ;;  %v957_v17 = vld [vmem:[%s4475_s4 + $0x10] sm:$0xff] }
  0x60   :  { %v960_v18 = vld [vmem:[%s4475_s4 + $0x28] sm:$0xff]  ;;  %v959_v19 = vld [vmem:[%s4475_s4 + $0x20] sm:$0xff]  ;;  %v962_v20 = vld [vmem:[%s4475_s4 + $0x38] sm:$0xff] }
  0x61   :  { %336 = vperm.xlu1 %3051, %v122_v11   ;;  %346 = vperm.xlu0 %3050, %v124_v12   ;;  %v961_v21 = vld [vmem:[%s4475_s4 + $0x30] sm:$0xff]  ;;  %v964_v22 = vld [vmem:[%s4475_s4 + $0x48] sm:$0xff]  ;;  %v963_v23 = vld [vmem:[%s4475_s4 + $0x40] sm:$0xff] }
  0x62   :  { %v966_v24 = vld [vmem:[%s4475_s4 + $0x58] sm:$0xff]  ;;  %v965_v25 = vld [vmem:[%s4475_s4 + $0x50] sm:$0xff]  ;;  %v968_v26 = vld [vmem:[%s4475_s4 + $0x68] sm:$0xff] }
  0x63   :  { %2981 = vmatmul.mubr.msk.bf16.gmra.mxu0 %vm489_vm0, %v3080_v13  ;;  %v967_v27 = vld [vmem:[%s4475_s4 + $0x60] sm:$0xff]  ;;  %v970_v28 = vld [vmem:[%s4475_s4 + $0x78] sm:$0xff]  ;;  %v969_v29 = vld [vmem:[%s4475_s4 + $0x70] sm:$0xff] }
  0x64   :  { %v972_v30 = vld [vmem:[%s4475_s4 + $0x88] sm:$0xff]  ;;  %v971_v31 = vld [vmem:[%s4475_s4 + $0x80] sm:$0xff]  ;;  %v974_v32 = vld [vmem:[%s4475_s4 + $0x98] sm:$0xff] }
  0x65   :  { %1010 = vperm.xlu1 %3051, %v956_v14   ;;  %1005 = vperm.xlu0 %3050, %v955_v15   ;;  %v973_v33 = vld [vmem:[%s4475_s4 + $0x90] sm:$0xff]  ;;  %v976_v34 = vld [vmem:[%s4475_s4 + $0xa8] sm:$0xff]  ;;  %v975_v35 = vld [vmem:[%s4475_s4 + $0xa0] sm:$0xff] }
  0x66   :  { %v978_v36 = vld [vmem:[%s4475_s4 + $0xb8] sm:$0xff]  ;;  %v977_v37 = vld [vmem:[%s4475_s4 + $0xb0] sm:$0xff]  ;;  %v980_v38 = vld [vmem:[%s4475_s4 + $0xc8] sm:$0xff] }
  0x67   :  { %v979_v39 = vld [vmem:[%s4475_s4 + $0xc0] sm:$0xff]  ;;  %v982_v40 = vld [vmem:[%s4475_s4 + $0xd8] sm:$0xff]  ;;  %v981_v41 = vld [vmem:[%s4475_s4 + $0xd0] sm:$0xff] }
  0x68   :  { %v984_v42 = vld [vmem:[%s4475_s4 + $0xe8] sm:$0xff]  ;;  %v983_v43 = vld [vmem:[%s4475_s4 + $0xe0] sm:$0xff]  ;;  %v986_v46 = vld [vmem:[%s4475_s4 + $0xf8] sm:$0xff] }
  0x69   :  { %1020 = vperm.xlu1 %3051, %v958_v16   ;;  %1015 = vperm.xlu0 %3050, %v957_v17   ;;  %v985_v47 = vld [vmem:[%s4475_s4 + $0xf0] sm:$0xff]  ;;  %v988_v49 = vld [vmem:[%s4475_s4 + $0x108] sm:$0xff]  ;;  %v987_v50 = vld [vmem:[%s4475_s4 + $0x100] sm:$0xff] }
  0x6a   :  { %v990_v52 = vld [vmem:[%s4475_s4 + $0x118] sm:$0xff]  ;;  %v989_v53 = vld [vmem:[%s4475_s4 + $0x110] sm:$0xff]  ;;  %v992_v56 = vld [vmem:[%s4475_s4 + $0x128] sm:$0xff] }
  0x6b   :  { %v991_v57 = vld [vmem:[%s4475_s4 + $0x120] sm:$0xff]  ;;  %v994_v60 = vld [vmem:[%s4475_s4 + $0x138] sm:$0xff]  ;;  %v993_v61 = vld [vmem:[%s4475_s4 + $0x130] sm:$0xff] }
  0x6c   :  { %v3083_v58 = vld [vmem:[%s4474_s3 + $0x4] ss:$12 sps:$4 sm:$0xff]   ;;  %v996_v63 = vld [vmem:[%s4475_s4 + $0x148] sm:$0xff]  ;;  %v998_v3 = vld [vmem:[%s4475_s4 + $0x158] sm:$0xff] }
  0x6d   :  { %1030 = vperm.xlu1 %3051, %v960_v18   ;;  %1025 = vperm.xlu0 %3050, %v959_v19   ;;  %v995_v0 = vld [vmem:[%s4475_s4 + $0x140] sm:$0xff]  ;;  %v997_v5 = vld [vmem:[%s4475_s4 + $0x150] sm:$0xff]  ;;  %v1000_v7 = vld [vmem:[%s4475_s4 + $0x168] sm:$0xff] }
  0x6e   :  { %1659 = vmatprep.mubr.bf16.mxu1 %v3083_v58  ;;  %v999_v8 = vld [vmem:[%s4475_s4 + $0x160] sm:$0xff]  ;;  %v1002_v13 = vld [vmem:[%s4475_s4 + $0x178] sm:$0xff]  ;;  %v1001_v14 = vld [vmem:[%s4475_s4 + $0x170] sm:$0xff] }
  0x6f   :  { %v2759_v9 = vld [vmem:[%s4476_s5] sm:$0xff]   ;;  %v2854_v15 = vld [vmem:[%s4476_s5 + $0x8] sm:$0xff]  }
  0x70   :  { %v2760_v11 = vunpack.c.l.bf16 %v2759_v9  ;;  %v2761_v12 = vunpack.c.h.bf16 %v2759_v9  ;;  %v2764_v18 = vunpack.c.l.bf16 %v2854_v15  ;;  %v2862_v9 = vld [vmem:[%s4476_s5 + $0x48] sm:$0xff]  }
  0x71   :  { %1040 = vperm.xlu1 %3051, %v962_v20   ;;  %1035 = vperm.xlu0 %3050, %v961_v21   ;;  %v2855_v20 = vld [vmem:[%s4476_s5 + $0x10] sm:$0xff]   ;;  %v2765_v21 = vunpack.c.h.bf16 %v2854_v15 }
  0x72   :  { %v3052_v19 = vpack.i.bf16 %v2761_v12, %v2760_v11 }
  0x75   :  { %1050 = vperm.xlu1 %3051, %v964_v22   ;;  %1045 = vperm.xlu0 %3050, %v963_v23   ;;  %v2768_v22 = vunpack.c.l.bf16 %v2855_v20 }
  0x79   :  { %1060 = vperm.xlu1 %3051, %v966_v24   ;;  %1055 = vperm.xlu0 %3050, %v965_v25   ;;  %v2856_v24 = vld [vmem:[%s4476_s5 + $0x18] sm:$0xff]  }
  0x7d   :  { %1070 = vperm.xlu1 %3051, %v968_v26   ;;  %1065 = vperm.xlu0 %3050, %v967_v27   ;;  %v2772_v26 = vunpack.c.l.bf16 %v2856_v24  ;;  %v2769_v27 = vunpack.c.h.bf16 %v2855_v20 }
  0x80   :  { %v3583_v44 = vpop.permute.xlu1 %141  ;;  %v3585_v45 = vpop.permute.xlu0 %131 }
  0x81   :  { %1080 = vperm.xlu1 %3051, %v970_v28   ;;  %1075 = vperm.xlu0 %3050, %v969_v29   ;;  %v2857_v28 = vld [vmem:[%s4476_s5 + $0x20] sm:$0xff]  }
  0x84   :  { %v3593_v48 = vpop.permute.xlu1 %146  ;;  %v3601_v51 = vpop.permute.xlu0 %136 }
  0x85   :  { %1090 = vperm.xlu1 %3051, %v972_v30   ;;  %1085 = vperm.xlu0 %3050, %v971_v31   ;;  %v3096_v30 = vld [vmem:[%s4474_s3 + $0x8] ss:$12 sps:$4 sm:$0xff]  }
  0x86   :  { %3000 = vmatprep.mubr.bf16.mxu0 %v3096_v30 }
  0x88   :  { %v3609_v54 = vpop.permute.xlu1 %156  ;;  %v3611_v55 = vpop.permute.xlu0 %151 }
  0x89   :  { %1100 = vperm.xlu1 %3051, %v974_v32   ;;  %1095 = vperm.xlu0 %3050, %v973_v33  }
  0x8c   :  { %v3622_v59 = vpop.permute.xlu1 %166  ;;  %v3630_v62 = vpop.permute.xlu0 %161 }
  0x8d   :  { %1110 = vperm.xlu1 %3051, %v976_v34   ;;  %1105 = vperm.xlu0 %3050, %v975_v35   ;;  %v2776_v34 = vunpack.c.l.bf16 %v2857_v28  ;;  %v2773_v35 = vunpack.c.h.bf16 %v2856_v24 }
  0x90   :  { %v3638_v1 = vpop.permute.xlu1 %176  ;;  %v3640_v2 = vpop.permute.xlu0 %171 }
  0x91   :  { %1120 = vperm.xlu1 %3051, %v978_v36   ;;  %1115 = vperm.xlu0 %3050, %v977_v37   ;;  %v2858_v36 = vld [vmem:[%s4476_s5 + $0x28] sm:$0xff]  }
  0x94   :  { %v3648_v6 = vpop.permute.xlu1 %201  ;;  %v3659_v10 = vpop.permute.xlu0 %181 }
  0x95   :  { %1130 = vperm.xlu1 %3051, %v980_v38   ;;  %1125 = vperm.xlu0 %3050, %v979_v39   ;;  %v2780_v39 = vunpack.c.l.bf16 %v2858_v36 }
  0x98   :  { %v3670_v16 = vpop.permute.xlu1 %191  ;;  %v3672_v17 = vpop.permute.xlu0 %206 }
  0x99   :  { %1140 = vperm.xlu1 %3051, %v982_v40   ;;  %1135 = vperm.xlu0 %3050, %v981_v41   ;;  %v2777_v40 = vunpack.c.h.bf16 %v2857_v28  ;;  %v2864_v28 = vld [vmem:[%s4476_s5 + $0x58] sm:$0xff]  }
  0x9c   :  { %v3677_v23 = vpop.permute.xlu1 %186  ;;  %v3682_v25 = vpop.permute.xlu0 %196 }
  0x9d   :  { %1150 = vperm.xlu1 %3051, %v984_v42   ;;  %1145 = vperm.xlu0 %3050, %v983_v43   ;;  %v2859_v42 = vld [vmem:[%s4476_s5 + $0x30] sm:$0xff]  }
  0xa0   :  { %v3692_v31 = vpop.permute.xlu1 %216  ;;  %v3694_v32 = vpop.permute.xlu0 %211 }
  0xa1   :  { %1160 = vperm.xlu1 %3051, %v986_v46   ;;  %1155 = vperm.xlu0 %3050, %v985_v47  }
  0xa4   :  { %v3705_v41 = vpop.permute.xlu1 %281  ;;  %v3710_v43 = vpop.permute.xlu0 %221 }
  0xa5   :  { %1170 = vperm.xlu1 %3051, %v988_v49   ;;  %1165 = vperm.xlu0 %3050, %v987_v50   ;;  %v2784_v49 = vunpack.c.l.bf16 %v2859_v42  ;;  %v2781_v50 = vunpack.c.h.bf16 %v2858_v36  ;;  %v2804_v36 = vunpack.c.l.bf16 %v2864_v28 }
  0xa9   :  { %1180 = vperm.xlu1 %3051, %v990_v52   ;;  %1175 = vperm.xlu0 %3050, %v989_v53   ;;  %v2860_v52 = vld [vmem:[%s4476_s5 + $0x38] sm:$0xff]  }
  0xad   :  { %1190 = vperm.xlu1 %3051, %v992_v56   ;;  %1185 = vperm.xlu0 %3050, %v991_v57   ;;  %v3721_v56 = vpop.permute.xlu1 %271  ;;  %v3723_v57 = vpop.permute.xlu0 %286 }
  0xb1   :  { %1200 = vperm.xlu1 %3051, %v994_v60   ;;  %1195 = vperm.xlu0 %3050, %v993_v61   ;;  %v2788_v60 = vunpack.c.l.bf16 %v2860_v52  ;;  %v2785_v61 = vunpack.c.h.bf16 %v2859_v42  ;;  %v3737_v11 = vpop.permute.xlu0 %276 }
  0xb5   :  { %1210 = vperm.xlu1 %3051, %v996_v63   ;;  %1205 = vperm.xlu0 %3050, %v995_v0   ;;  %v2861_v63 = vld [vmem:[%s4476_s5 + $0x40] sm:$0xff]  }
  0xb6   :  { %v2793_v15 = vunpack.c.h.bf16 %v2861_v63 }
  0xb9   :  { %1220 = vperm.xlu1 %3051, %v998_v3   ;;  %1215 = vperm.xlu0 %3050, %v997_v5   ;;  %v2792_v5 = vunpack.c.l.bf16 %v2861_v63 }
  0xbd   :  { %1230 = vperm.xlu1 %3051, %v1000_v7   ;;  %1225 = vperm.xlu0 %3050, %v999_v8   ;;  %v2789_v7 = vunpack.c.h.bf16 %v2860_v52  ;;  %v3732_v8 = vpop.permute.xlu1 %261  ;;  %v2865_v52 = vld [vmem:[%s4476_s5 + $0x60] sm:$0xff]  }
  0xc1   :  { %1240 = vperm.xlu1 %3051, %v1002_v13   ;;  %1235 = vperm.xlu0 %3050, %v1001_v14   ;;  %v2796_v14 = vunpack.c.l.bf16 %v2862_v9  ;;  %v3742_v20 = vpop.permute.xlu1 %251 }
  0xc5   :  { %2233 = vperm.xlu1 %3051, %v2764_v18   ;;  %3053 = vperm.xlu0 %3050, %v3052_v19   ;;  %v2863_v18 = vld [vmem:[%s4476_s5 + $0x50] sm:$0xff]  }
  0xc6   :  { %v2800_v24 = vunpack.c.l.bf16 %v2863_v18 }
  0xc9   :  { %2243 = vperm.xlu1 %3051, %v2768_v22   ;;  %2238 = vperm.xlu0 %3050, %v2765_v21   ;;  %v3744_v21 = vpop.permute.xlu0 %266 }
  0xcb   :  { %v3687_v29 = vpop.f32.mrf.mxu0 }
  0xcd   :  { %v3696_v33 = vpop.f32.mrf.mxu0  ;;  %2253 = vperm.xlu1 %3051, %v2772_v26   ;;  %2248 = vperm.xlu0 %3050, %v2769_v27   ;;  %v2797_v26 = vunpack.c.h.bf16 %v2862_v9  ;;  %v2805_v9 = vunpack.c.h.bf16 %v2864_v28 }
  0xcf   :  { %v3701_v37 = vpop.f32.mrf.mxu0 }
  0xd1   :  { %v3703_v38 = vpop.f32.mrf.mxu0  ;;  %2263 = vperm.xlu1 %3051, %v2776_v34   ;;  %2258 = vperm.xlu0 %3050, %v2773_v35  }
  0xd3   :  { %v3712_v46 = vpop.f32.mrf.mxu0 }
  0xd5   :  { %v3714_v47 = vpop.f32.mrf.mxu0  ;;  %2273 = vperm.xlu1 %3051, %v2780_v39   ;;  %2268 = vperm.xlu0 %3050, %v2777_v40   ;;  %v2801_v39 = vunpack.c.h.bf16 %v2863_v18  ;;  %v3751_v40 = vpop.permute.xlu1 %241 }
  0xd7   :  { %v3719_v53 = vpop.f32.mrf.mxu0 }
  0xd9   :  { %v3725_v58 = vpop.f32.mrf.mxu0  ;;  %2283 = vperm.xlu1 %3051, %v2784_v49   ;;  %2278 = vperm.xlu0 %3050, %v2781_v50  }
  0xdb   :  { %v2946_v0 = vpop.f32.mrf.mxu0 }
  0xdd   :  { %v3730_v3 = vpop.f32.mrf.mxu0  ;;  %2293 = vperm.xlu1 %3051, %v2788_v60   ;;  %2288 = vperm.xlu0 %3050, %v2785_v61   ;;  %v3758_v60 = vpop.permute.xlu0 %256 }
  0xde   :  { %v629_v28 = vadd.f32 %v3730_v3, %v3640_v2 }
  0xdf   :  { %v2947_v12 = vpop.f32.mrf.mxu0 }
  0xe0   :  { %v640_v61 = vadd.f32 %v2947_v12, %v3677_v23  ;;  %v3772_v23 = vpop.permute.xlu1 %231 }
  0xe1   :  { %v631_v13 = vpop.f32.mrf.mxu0  ;;  %2303 = vperm.xlu1 %3051, %v2792_v5   ;;  %2298 = vperm.xlu0 %3050, %v2789_v7  }
  0xe2   :  { %v798_v12 = vmax.f32 %v640_v61, 0.0 }
  0xe3   :  { %v2950_v19 = vpop.f32.mrf.mxu0 }
  0xe4   :  { %v653_v27 = vadd.f32 %v2950_v19, %v3648_v6  ;;  %v632_v19 = vadd.f32 %v631_v13, %v3638_v1  ;;  %v624_v1 = vadd.f32 %v3719_v53, %v3622_v59  ;;  %v3791_v3 = vpop.permute.xlu1 %226 }
  0xe5   :  { %v644_v22 = vpop.f32.mrf.mxu0  ;;  %2313 = vperm.xlu1 %3051, %v2796_v14   ;;  %2308 = vperm.xlu0 %3050, %v2793_v15   ;;  %v2866_v15 = vld [vmem:[%s4476_s5 + $0x68] sm:$0xff]  }
  0xe6   :  { %v801_v42 = vmax.f32 %v653_v27, 0.0  ;;  %v645_v49 = vadd.f32 %v644_v22, %v3670_v16  ;;  %v2808_v16 = vunpack.c.l.bf16 %v2865_v52  ;;  %v2813_v2 = vunpack.c.h.bf16 %v2866_v15 }
  0xe7   :  { %v2951_v30 = vpop.f32.mrf.mxu0 }
  0xe8   :  { %v656_v34 = vadd.f32 %v2951_v30, %v3672_v17  ;;  %v799_v14 = vmax.f32 %v645_v49, 0.0  ;;  %v2867_v30 = vld [vmem:[%s4476_s5 + $0x70] sm:$0xff]   ;;  %v795_v49 = vmax.f32 %v629_v28, 0.0 }
  0xe9   :  { %v647_v35 = vpop.f32.mrf.mxu0  ;;  %2323 = vperm.xlu1 %3051, %v2800_v24   ;;  %2318 = vperm.xlu0 %3050, %v2797_v26   ;;  %v3775_v24 = vpop.permute.xlu0 %246 }
  0xea   :  { %v802_v50 = vmax.f32 %v656_v34, 0.0  ;;  %v648_v6 = vadd.f32 %v647_v35, %v3682_v25  ;;  %v637_v25 = vadd.f32 %v2946_v0, %v3659_v10  ;;  %v2812_v10 = vunpack.c.l.bf16 %v2866_v15 }
  0xeb   :  { %v3760_v17 = vpop.f32.mrf.mxu0  ;;  %v2809_v0 = vunpack.c.h.bf16 %v2865_v52  ;;  %v796_v35 = vmax.f32 %v632_v19, 0.0  ;;  %v616_v52 = vadd.f32 %v3725_v58, %v3609_v54  ;;  %v3815_v54 = vpop.permute.xlu1 %296  ;;  %v608_v58 = vadd.f32 %v3701_v37, %v3593_v48 }
  0xec   :  { %v800_v63 = vmax.f32 %v648_v6, 0.0  ;;  %v842_v5 = vpack.c.bf16 %v802_v50, %v801_v42  ;;  %v797_v27 = vmax.f32 %v637_v25, 0.0  ;;  %v621_v42 = vadd.f32 %v3712_v46, %v3630_v62  ;;  %v2868_v50 = vld [vmem:[%s4476_s5 + $0x78] sm:$0xff]  }
  0xed   :  { %v3763_v7 = vpop.f32.mrf.mxu0  ;;  %2333 = vperm.xlu1 %3051, %v2804_v36   ;;  %2328 = vperm.xlu0 %3050, %v2801_v39   ;;  %v2816_v39 = vunpack.c.l.bf16 %v2867_v30  ;;  %v3798_v59 = vpop.permute.xlu0 %236  ;;  %v794_v6 = vmax.f32 %v624_v1, 0.0  ;;  %v839_v61 = vpack.c.bf16 %v796_v35, %v795_v49  ;;  %v2820_v62 = vunpack.c.l.bf16 %v2868_v50 }
  0xee   :  { %1628 = vmatpush1.bf16.msra.mxu1 %v842_v5  ;;  %v841_v22 = vpack.c.bf16 %v800_v63, %v799_v14  ;;  %v840_v13 = vpack.c.bf16 %v798_v12, %v797_v27  ;;  %v2817_v46 = vunpack.c.h.bf16 %v2867_v30  ;;  %v793_v5 = vmax.f32 %v621_v42, 0.0 }
  0xef   :  { %v3769_v18 = vpop.f32.mrf.mxu0  ;;  %1629 = vmatprep.subr.bf16.mxu1 %v3199_v4  ;;  %v792_v15 = vmax.f32 %v616_v52, 0.0  ;;  %v790_v37 = vmax.f32 %v608_v58, 0.0  ;;  %v600_v27 = vadd.f32 %v3703_v38, %v3601_v51  ;;  %v597_v35 = vadd.f32 %v3696_v33, %v3585_v45  ;;  %v2872_v33 = vld [vmem:[%s4476_s5 + $0x98] sm:$0xff]  }
  0xf0   :  { %v838_v14 = vpack.c.bf16 %v794_v6, %v793_v5  ;;  %v2836_v58 = vunpack.c.l.bf16 %v2872_v33 }
  0xf1   :  { %v3777_v26 = vpop.f32.mrf.mxu0  ;;  %2343 = vperm.xlu1 %3051, %v2808_v16   ;;  %2338 = vperm.xlu0 %3050, %v2805_v9   ;;  %v613_v16 = vadd.f32 %v3714_v47, %v3611_v55  ;;  %v2869_v9 = vld [vmem:[%s4476_s5 + $0x80] sm:$0xff]   ;;  %v3819_v12 = vpop.permute.xlu0 %291  ;;  %v2821_v47 = vunpack.c.h.bf16 %v2868_v50  ;;  %v788_v42 = vmax.f32 %v600_v27, 0.0  ;;  %v787_v52 = vmax.f32 %v597_v35, 0.0 }
  0xf2   :  { %1630 = vmatpush1.bf16.msra.mxu1 %v841_v22  ;;  %v2824_v55 = vunpack.c.l.bf16 %v2869_v9  ;;  %v605_v22 = vadd.f32 %v3687_v29, %v3583_v44  ;;  %v3831_v44 = vpop.permute.xlu1 %306 }
  0xf3   :  { %v3784_v34 = vpop.f32.mrf.mxu0  ;;  %1631 = vmatprep.subr.bf16.mxu1 %v3199_v4 }
  0xf4   :  { %v789_v29 = vmax.f32 %v605_v22, 0.0  ;;  %v2873_v22 = vld [vmem:[%s4476_s5 + $0xa0] sm:$0xff]  }
  0xf5   :  { %v3789_v36 = vpop.f32.mrf.mxu0  ;;  %2353 = vperm.xlu1 %3051, %v2812_v10   ;;  %2348 = vperm.xlu0 %3050, %v2809_v0   ;;  %v791_v10 = vmax.f32 %v613_v16, 0.0  ;;  %v2870_v0 = vld [vmem:[%s4476_s5 + $0x88] sm:$0xff]  }
  0xf6   :  { %1632 = vmatpush1.bf16.msra.mxu1 %v840_v13  ;;  %v2828_v1 = vunpack.c.l.bf16 %v2870_v0  ;;  %v2825_v13 = vunpack.c.h.bf16 %v2869_v9  ;;  %v836_v38 = vpack.c.bf16 %v790_v37, %v789_v29  ;;  %v2829_v6 = vunpack.c.h.bf16 %v2870_v0  ;;  %v2874_v29 = vld [vmem:[%s4476_s5 + $0xa8] sm:$0xff]  }
  0xf7   :  { %v3800_v53 = vpop.f32.mrf.mxu0  ;;  %1633 = vmatprep.subr.bf16.mxu1 %v3199_v4  ;;  %v837_v28 = vpack.c.bf16 %v792_v15, %v791_v10 }
  0xf9   :  { %v3805_v63 = vpop.f32.mrf.mxu0  ;;  %2363 = vperm.xlu1 %3051, %v2816_v39   ;;  %2358 = vperm.xlu0 %3050, %v2813_v2   ;;  %v2871_v39 = vld [vmem:[%s4476_s5 + $0x90] sm:$0xff]   ;;  %v3838_v2 = vpop.permute.xlu0 %301 }
  0xfa   :  { %1634 = vmatpush1.bf16.msra.mxu1 %v839_v61  ;;  %v2832_v50 = vunpack.c.l.bf16 %v2871_v39 }
  0xfb   :  { %v3812_v25 = vpop.f32.mrf.mxu0  ;;  %1635 = vmatprep.subr.bf16.mxu1 %v3199_v4 }
  0xfd   :  { %v3821_v19 = vpop.f32.mrf.mxu0  ;;  %2373 = vperm.xlu1 %3051, %v2820_v62   ;;  %2368 = vperm.xlu0 %3050, %v2817_v46   ;;  %v3846_v62 = vpop.permute.xlu1 %316  ;;  %v835_v46 = vpack.c.bf16 %v788_v42, %v787_v52 }
  0xfe   :  { %1636 = vmatpush1.bf16.msra.mxu1 %v838_v14  ;;  %v3849_v16 = vpop.permute.xlu0 %311 }
  0xff   :  { %v2963_v48 = vpop.f32.mrf.mxu0  ;;  %1637 = vmatprep.subr.bf16.mxu1 %v3199_v4 }
 0x101   :  { %v695_v30 = vpop.f32.mrf.mxu0  ;;  %2383 = vperm.xlu1 %3051, %v2824_v55   ;;  %2378 = vperm.xlu0 %3050, %v2821_v47  }
 0x102   :  { %1638 = vmatpush1.bf16.msra.mxu1 %v837_v28  ;;  %v2837_v28 = vunpack.c.h.bf16 %v2872_v33 }
 0x103   :  { %v2966_v51 = vpop.f32.mrf.mxu0  ;;  %1639 = vmatprep.subr.bf16.mxu1 %v3199_v4 }
 0x104   :  { %v717_v45 = vadd.f32 %v2966_v51, %v3705_v41  ;;  %v2833_v41 = vunpack.c.h.bf16 %v2871_v39  ;;  %v696_v39 = vadd.f32 %v695_v30, %v3758_v60  ;;  %v688_v30 = vadd.f32 %v3800_v53, %v3775_v24 }
 0x105   :  { %v708_v49 = vpop.f32.mrf.mxu0  ;;  %2393 = vperm.xlu1 %3051, %v2828_v1   ;;  %2388 = vperm.xlu0 %3050, %v2825_v13   ;;  %v701_v1 = vadd.f32 %v3812_v25, %v3732_v8  ;;  %v2844_v8 = vunpack.c.l.bf16 %v2874_v29  ;;  %v2841_v25 = vunpack.c.h.bf16 %v2873_v22 }
 0x106   :  { %1640 = vmatpush1.bf16.msra.mxu1 %v836_v38  ;;  %v817_v14 = vmax.f32 %v717_v45, 0.0  ;;  %v709_v15 = vadd.f32 %v708_v49, %v3721_v56  ;;  %v2840_v56 = vunpack.c.l.bf16 %v2873_v22  ;;  %v693_v49 = vadd.f32 %v3821_v19, %v3742_v20 }
 0x107   :  { %v2967_v61 = vpop.f32.mrf.mxu0  ;;  %1641 = vmatprep.subr.bf16.mxu1 %v3199_v4  ;;  %v813_v42 = vmax.f32 %v701_v1, 0.0  ;;  %v812_v45 = vmax.f32 %v696_v39, 0.0  ;;  %v2845_v19 = vunpack.c.h.bf16 %v2874_v29  ;;  %v810_v53 = vmax.f32 %v688_v30, 0.0 }
 0x108   :  { %v720_v5 = vadd.f32 %v2967_v61, %v3723_v57  ;;  %v704_v57 = vadd.f32 %v2963_v48, %v3744_v21  ;;  %v815_v13 = vmax.f32 %v709_v15, 0.0  ;;  %v3869_v21 = vpop.permute.xlu0 %321 }
 0x109   :  { %v711_v9 = vpop.f32.mrf.mxu0  ;;  %2403 = vperm.xlu1 %3051, %v2832_v50   ;;  %2398 = vperm.xlu0 %3050, %v2829_v6   ;;  %v2875_v50 = vld [vmem:[%s4476_s5 + $0xb0] sm:$0xff]  }
 0x10a   :  { %v818_v55 = vmax.f32 %v720_v5, 0.0  ;;  %v712_v47 = vadd.f32 %v711_v9, %v3737_v11  ;;  %1642 = vmatpush1.bf16.msra.mxu1 %v835_v46  ;;  %v3862_v11 = vpop.permute.xlu1 %326  ;;  %v814_v35 = vmax.f32 %v704_v57, 0.0  ;;  %v2848_v20 = vunpack.c.l.bf16 %v2875_v50  ;;  %v2876_v9 = vld [vmem:[%s4476_s5 + $0xb8] sm:$0xff]  }
 0x10b   :  { %v3856_v10 = vpop.f32.mrf.mxu0  ;;  %1643 = vmatprep.subr.bf16.mxu1 %v3199_v4  ;;  %v685_v46 = vadd.f32 %v3784_v34, %v3751_v40  ;;  %v811_v5 = vmax.f32 %v693_v49, 0.0  ;;  %v2852_v40 = vunpack.c.l.bf16 %v2876_v9  ;;  %v2849_v34 = vunpack.c.h.bf16 %v2875_v50 }
 0x10c   :  { %v850_v0 = vpack.c.bf16 %v818_v55, %v817_v14  ;;  %v816_v37 = vmax.f32 %v712_v47, 0.0  ;;  %v848_v52 = vpack.c.bf16 %v814_v35, %v813_v42  ;;  %v3887_v33 = vpop.permute.xlu0 %331  ;;  %v677_v47 = vadd.f32 %v3789_v36, %v3772_v23  ;;  %v2611_v23 = vld [vmem:[#allocation2] sm:$0x1] }
 0x10d   :  { %v3860_v27 = vpop.f32.mrf.mxu0  ;;  %2413 = vperm.xlu1 %3051, %v2836_v58   ;;  %2408 = vperm.xlu0 %3050, %v2833_v41   ;;  %v680_v58 = vadd.f32 %v3805_v63, %v3798_v59  ;;  %v847_v41 = vpack.c.bf16 %v812_v45, %v811_v5  ;;  %v809_v55 = vmax.f32 %v685_v46, 0.0  ;;  %v672_v59 = vadd.f32 %v3769_v18, %v3791_v3 }
 0x10e   :  { %1644 = vmatpush2.bf16.msra.mxu1 %v850_v0  ;;  %v849_v51 = vpack.c.bf16 %v816_v37, %v815_v13  ;;  %v362_v60 = vpop.permute.xlu1 %361  ;;  %v807_v1 = vmax.f32 %v677_v47, 0.0  ;;  %v664_v18 = vadd.f32 %v3777_v26, %v3692_v31 }
 0x10f   :  { %v3871_v48 = vpop.f32.mrf.mxu0  ;;  %1645 = vmatprep.subr.bf16.mxu1 %v3199_v4  ;;  %v846_v63 = vpack.c.bf16 %v810_v53, %v809_v55  ;;  %v808_v0 = vmax.f32 %v680_v58, 0.0  ;;  %v806_v29 = vmax.f32 %v672_v59, 0.0 }
 0x110   :  { %v367_v22 = vpop.permute.xlu0 %366 }
 0x111   :  { %v3875_v38 = vpop.f32.mrf.mxu0  ;;  %2423 = vperm.xlu1 %3051, %v2840_v56   ;;  %2418 = vperm.xlu0 %3050, %v2837_v28   ;;  %v2853_v56 = vunpack.c.h.bf16 %v2876_v9  ;;  %v669_v28 = vadd.f32 %v3760_v17, %v3710_v43  ;;  %v845_v3 = vpack.c.bf16 %v808_v0, %v807_v1  ;;  %v661_v43 = vadd.f32 %v3763_v7, %v3694_v32  ;;  %v3081_v32 = vld [vmem:[%s4474_s3] ss:$12 sps:$4 sm:$0xff]  }
 0x112   :  { %1646 = vmatpush2.bf16.msra.mxu1 %v849_v51  ;;  %v352_v15 = vpop.permute.xlu1 %351  ;;  %v3087_v0 = vld [vmem:[%s4474_s3 + $0x34] ss:$12 sps:$4 sm:$0xff]  }
 0x113   :  { %v3882_v6 = vpop.f32.mrf.mxu0  ;;  %1647 = vmatprep.subr.bf16.mxu1 %v3199_v4  ;;  %v805_v51 = vmax.f32 %v669_v28, 0.0  ;;  %v803_v49 = vmax.f32 %v661_v43, 0.0  ;;  %v3102_v43 = vld [vmem:[%s4474_s3 + $0x50] ss:$12 sps:$4 sm:$0xff]  }
 0x114   :  { %v357_v35 = vpop.permute.xlu0 %356 }
 0x115   :  { %v3889_v61 = vpop.f32.mrf.mxu0  ;;  %2433 = vperm.xlu1 %3051, %v2844_v8   ;;  %2428 = vperm.xlu0 %3050, %v2841_v25   ;;  %v844_v8 = vpack.c.bf16 %v806_v29, %v805_v51  ;;  %v804_v25 = vmax.f32 %v664_v18, 0.0  ;;  %v3092_v18 = vld [vmem:[%s4474_s3 + $0x48] ss:$12 sps:$4 sm:$0xff]   ;;  %v3100_v51 = vld [vmem:[%s4474_s3 + $0x78] ss:$12 sps:$4 sm:$0xff]  }
 0x116   :  { %1648 = vmatpush2.bf16.msra.mxu1 %v848_v52  ;;  %v342_v13 = vpop.permute.xlu1 %341 }
 0x117   :  { %v3896_v24 = vpop.f32.mrf.mxu0  ;;  %1649 = vmatprep.subr.bf16.mxu1 %v3199_v4  ;;  %v843_v26 = vpack.c.bf16 %v804_v25, %v803_v49  ;;  %v3105_v25 = vld [vmem:[%s4474_s3 + $0x90] ss:$12 sps:$4 sm:$0xff]   ;;  %v3108_v49 = vld [vmem:[%s4474_s3 + $0xac] ss:$12 sps:$4 sm:$0xff]  }
 0x118   :  { %v347_v45 = vpop.permute.xlu0 %346 }
 0x119   :  { %v3901_v14 = vpop.f32.mrf.mxu0  ;;  %2443 = vperm.xlu1 %3051, %v2848_v20   ;;  %2438 = vperm.xlu0 %3050, %v2845_v19  }
 0x11a   :  { %1650 = vmatpush2.bf16.msra.mxu1 %v847_v41  ;;  %v337_v41 = vpop.permute.xlu1 %336 }
 0x11b   :  { %v2978_v57 = vpop.f32.mrf.mxu0  ;;  %1651 = vmatprep.subr.bf16.mxu1 %v3199_v4 }
 0x11c   :  { %v765_v9 = vadd.f32 %v2978_v57, %v342_v13  ;;  %v752_v57 = vadd.f32 %v3896_v24, %v3862_v11  ;;  %v741_v24 = vadd.f32 %v3889_v61, %v3849_v16  ;;  %v728_v61 = vadd.f32 %v3875_v38, %v3815_v54 }
 0x11d   :  { %v756_v37 = vpop.f32.mrf.mxu0  ;;  %2453 = vperm.xlu1 %3051, %v2852_v40   ;;  %2448 = vperm.xlu0 %3050, %v2849_v34  }
 0x11e   :  { %1652 = vmatpush2.bf16.msra.mxu1 %v846_v63  ;;  %v829_v55 = vmax.f32 %v765_v9, 0.0  ;;  %v757_v47 = vadd.f32 %v756_v37, %v3887_v33  ;;  %v826_v33 = vmax.f32 %v752_v57, 0.0  ;;  %v744_v37 = vadd.f32 %v3901_v14, %v3846_v62  ;;  %v3090_v62 = vld [vmem:[%s4474_s3 + $0x4c] ss:$12 sps:$4 sm:$0xff]   ;;  %v4030_v9 = vpop.permute.xlu0 %1005  ;;  %v3147_v57 = vld [vmem:[%s4474_s3 + $0x188] ss:$12 sps:$4 sm:$0xff]  }
 0x11f   :  { %v2979_v36 = vpop.f32.mrf.mxu0  ;;  %1653 = vmatprep.subr.bf16.mxu1 %v3199_v4  ;;  %v733_v14 = vadd.f32 %v3856_v10, %v3838_v2  ;;  %v823_v13 = vmax.f32 %v741_v24, 0.0  ;;  %v820_v10 = vmax.f32 %v728_v61, 0.0  ;;  %v3136_v24 = vld [vmem:[%s4474_s3 + $0x138] ss:$12 sps:$4 sm:$0xff]   ;;  %v3165_v61 = vld [vmem:[%s4474_s3 + $0x200] ss:$12 sps:$4 sm:$0xff]  }
 0x120   :  { %v768_v7 = vadd.f32 %v2979_v36, %v347_v45  ;;  %v827_v28 = vmax.f32 %v757_v47, 0.0  ;;  %v824_v36 = vmax.f32 %v744_v37, 0.0  ;;  %v3115_v45 = vld [vmem:[%s4474_s3 + $0xc0] ss:$12 sps:$4 sm:$0xff]   ;;  %v3129_v47 = vld [vmem:[%s4474_s3 + $0x124] ss:$12 sps:$4 sm:$0xff]  }
 0x121   :  { %v759_v39 = vpop.f32.mrf.mxu0  ;;  %2614 = vperm.xlu1 %3051, %v2611_v23   ;;  %2458 = vperm.xlu0 %3050, %v2853_v56   ;;  %v749_v56 = vadd.f32 %v3882_v6, %v3869_v21  ;;  %v3089_v23 = vld [vmem:[%s4474_s3 + $0x30] ss:$12 sps:$4 sm:$0xff]   ;;  %v736_v21 = vadd.f32 %v3871_v48, %v3831_v44  ;;  %v821_v44 = vmax.f32 %v733_v14, 0.0  ;;  %v725_v48 = vadd.f32 %v3860_v27, %v3819_v12  ;;  %v3095_v12 = vld [vmem:[%s4474_s3 + $0x60] ss:$12 sps:$4 sm:$0xff]  }
 0x122   :  { %1654 = vmatpush2.bf16.msra.mxu1 %v845_v3  ;;  %v830_v40 = vmax.f32 %v768_v7, 0.0  ;;  %v760_v34 = vadd.f32 %v759_v39, %v337_v41  ;;  %v853_v29 = vpack.c.bf16 %v824_v36, %v823_v13  ;;  %v3093_v3 = vld [vmem:[%s4474_s3 + $0x64] ss:$12 sps:$4 sm:$0xff]   ;;  %v3097_v27 = vld [vmem:[%s4474_s3 + $0x20] ss:$12 sps:$4 sm:$0xff]  }
 0x123   :  { %v2982_v17 = vpop.f32.mrf.mxu0  ;;  %1655 = vmatprep.subr.bf16.mxu1 %v3199_v4  ;;  %v825_v11 = vmax.f32 %v749_v56, 0.0  ;;  %v822_v16 = vmax.f32 %v736_v21, 0.0  ;;  %v819_v54 = vmax.f32 %v725_v48, 0.0  ;;  %v3101_v39 = vld [vmem:[%s4474_s3 + $0x38] ss:$12 sps:$4 sm:$0xff]  }
 0x124   :  { %v781_v50 = vadd.f32 %v2982_v17, %v362_v60  ;;  %v3084_v60 = vld [vmem:[%s4474_s3 + $0x1c] ss:$12 sps:$4 sm:$0xff]   ;;  %v856_v59 = vpack.c.bf16 %v830_v40, %v829_v55  ;;  %v828_v63 = vmax.f32 %v760_v34, 0.0  ;;  %v3103_v17 = vld [vmem:[%s4474_s3 + $0x94] ss:$12 sps:$4 sm:$0xff]   ;;  %v4044_v40 = vpop.permute.xlu1 %1010  ;;  %v4046_v34 = vpop.permute.xlu0 %1015 }
 0x125   :  { %v772_v42 = vpop.f32.mrf.mxu0  ;;  %v854_v6 = vpack.c.bf16 %v826_v33, %v825_v11  ;;  %v852_v2 = vpack.c.bf16 %v822_v16, %v821_v44  ;;  %v851_v38 = vpack.c.bf16 %v820_v10, %v819_v54  ;;  %v3123_v7 = vld [vmem:[%s4474_s3 + $0xf8] ss:$12 sps:$4 sm:$0xff]   ;;  %v3149_v33 = vld [vmem:[%s4474_s3 + $0x1a0] ss:$12 sps:$4 sm:$0xff]   ;;  %v3157_v21 = vld [vmem:[%s4474_s3 + $0x1d0] ss:$12 sps:$4 sm:$0xff]  }
 0x126   :  { %1656 = vmatpush2.bf16.msra.mxu1 %v844_v8  ;;  %v773_v30 = vadd.f32 %v772_v42, %v352_v15  ;;  %v833_v19 = vmax.f32 %v781_v50, 0.0  ;;  %v855_v1 = vpack.c.bf16 %v828_v63, %v827_v28  ;;  %v3106_v8 = vld [vmem:[%s4474_s3 + $0x68] ss:$12 sps:$4 sm:$0xff]   ;;  %v3107_v42 = vld [vmem:[%s4474_s3 + $0x80] ss:$12 sps:$4 sm:$0xff]  }
 0x127   :  { %v2983_v31 = vpop.f32.mrf.mxu0  ;;  %1657 = vmatprep.subr.bf16.mxu1 %v3199_v4  ;;  %v3111_v50 = vld [vmem:[%s4474_s3 + $0x98] ss:$12 sps:$4 sm:$0xff]   ;;  %v3134_v28 = vld [vmem:[%s4474_s3 + $0x13c] ss:$12 sps:$4 sm:$0xff]  }
 0x128   :  { %v784_v52 = vadd.f32 %v2983_v31, %v367_v22  ;;  %v831_v4 = vmax.f32 %v773_v30, 0.0  ;;  %v3086_v22 = vld [vmem:[%s4474_s3 + $0x18] ss:$12 sps:$4 sm:$0xff]   ;;  %v3110_v31 = vld [vmem:[%s4474_s3 + $0xa8] ss:$12 sps:$4 sm:$0xff]   ;;  %v4051_v55 = vpop.permute.xlu1 %1020 }
 0x129   :  { %v775_v20 = vpop.f32.mrf.mxu0  ;;  %v3113_v30 = vld [vmem:[%s4474_s3 + $0xc4] ss:$12 sps:$4 sm:$0xff]   ;;  %v3142_v16 = vld [vmem:[%s4474_s3 + $0x16c] ss:$12 sps:$4 sm:$0xff]  }
 0x12a   :  { %v834_v46 = vmax.f32 %v784_v52, 0.0  ;;  %v776_v5 = vadd.f32 %v775_v20, %v357_v35  ;;  %1658 = vmatpush2.bf16.msra.mxu1 %v843_v26  ;;  %v3098_v35 = vld [vmem:[%s4474_s3 + $0x7c] ss:$12 sps:$4 sm:$0xff]   ;;  %v3117_v20 = vld [vmem:[%s4474_s3 + $0xe0] ss:$12 sps:$4 sm:$0xff]  }
 0x12b   :  { %v3112_v26 = vld [vmem:[%s4474_s3 + $0xb0] ss:$12 sps:$4 sm:$0xff]   ;;  %v3116_v52 = vld [vmem:[%s4474_s3 + $0xc8] ss:$12 sps:$4 sm:$0xff]   ;;  %v3139_v41 = vld [vmem:[%s4474_s3 + $0x158] ss:$12 sps:$4 sm:$0xff]  }
 0x12c   :  { %v858_v53 = vpack.c.bf16 %v834_v46, %v833_v19  ;;  %v832_v58 = vmax.f32 %v776_v5, 0.0  ;;  %v3120_v19 = vld [vmem:[%s4474_s3 + $0xd8] ss:$12 sps:$4 sm:$0xff]   ;;  %v3121_v46 = vld [vmem:[%s4474_s3 + $0xf4] ss:$12 sps:$4 sm:$0xff]   ;;  %v4064_v63 = vpop.permute.xlu1 %1030 }
 0x12d   :  { %1660 = vmatmul.mubr.bf16.vlgmr.msra.gmra.mxu1 %v3081_v32  ;;  %v3118_v32 = vld [vmem:[%s4474_s3 + $0xdc] ss:$12 sps:$4 sm:$0xff]   ;;  %v3155_v37 = vld [vmem:[%s4474_s3 + $0x1b8] ss:$12 sps:$4 sm:$0xff]  }
 0x12e   :  { %v857_v15 = vpack.c.bf16 %v832_v58, %v831_v4  ;;  %2984 = vmatprep.subr.bf16.mxu0 %v858_v53  ;;  %1667 = vmatprep.mubr.bf16.mxu1 %v3084_v60  ;;  %v3125_v5 = vld [vmem:[%s4474_s3 + $0x110] ss:$12 sps:$4 sm:$0xff]   ;;  %v3131_v60 = vld [vmem:[%s4474_s3 + $0x128] ss:$12 sps:$4 sm:$0xff]   ;;  %v3133_v58 = vld [vmem:[%s4474_s3 + $0x140] ss:$12 sps:$4 sm:$0xff]  }
 0x12f   :  { %2985 = vmatpush3.bf16.msra.mxu0 %v858_v53  ;;  %v3124_v4 = vld [vmem:[%s4474_s3 + $0xf0] ss:$12 sps:$4 sm:$0xff]   ;;  %v3126_v53 = vld [vmem:[%s4474_s3 + $0x10c] ss:$12 sps:$4 sm:$0xff]  }
 0x130   :  { %2986 = vmatprep.subr.bf16.mxu0 %v857_v15  ;;  %v3140_v14 = vld [vmem:[%s4474_s3 + $0x150] ss:$12 sps:$4 sm:$0xff]  }
 0x131   :  { %v3145_v10 = vld [vmem:[%s4474_s3 + $0x184] ss:$12 sps:$4 sm:$0xff]  }
 0x133   :  { %2987 = vmatpush3.bf16.msra.mxu0 %v857_v15  ;;  %v3128_v15 = vld [vmem:[%s4474_s3 + $0x108] ss:$12 sps:$4 sm:$0xff]  }
 0x134   :  { %2988 = vmatprep.subr.bf16.mxu0 %v856_v59 }
 0x135   :  { %1668 = vmatmul.mubr.bf16.gmra.mxu1 %v3086_v22  ;;  %v3141_v22 = vld [vmem:[%s4474_s3 + $0x170] ss:$12 sps:$4 sm:$0xff]  }
 0x136   :  { %1675 = vmatprep.mubr.bf16.mxu1 %v3087_v0  ;;  %v3132_v0 = vld [vmem:[%s4474_s3 + $0x120] ss:$12 sps:$4 sm:$0xff]  }
 0x137   :  { %2989 = vmatpush3.bf16.msra.mxu0 %v856_v59  ;;  %v4062_v59 = vpop.permute.xlu0 %1025 }
 0x138   :  { %2990 = vmatprep.subr.bf16.mxu0 %v855_v1 }
 0x13b   :  { %2991 = vmatpush3.bf16.msra.mxu0 %v855_v1  ;;  %v4069_v56 = vpop.permute.xlu0 %1035  ;;  %v4080_v1 = vpop.permute.xlu1 %1040 }
 0x13c   :  { %2992 = vmatprep.subr.bf16.mxu0 %v854_v6 }
 0x13d   :  { %1676 = vmatmul.mubr.bf16.gmra.mxu1 %v3089_v23  ;;  %v3137_v23 = vld [vmem:[%s4474_s3 + $0x154] ss:$12 sps:$4 sm:$0xff]  }
 0x13e   :  { %1683 = vmatprep.mubr.bf16.mxu1 %v3090_v62 }
 0x13f   :  { %2993 = vmatpush3.bf16.msra.mxu0 %v854_v6  ;;  %v4082_v11 = vpop.permute.xlu0 %1045  ;;  %v3163_v6 = vld [vmem:[%s4474_s3 + $0x1e8] ss:$12 sps:$4 sm:$0xff]   ;;  %v4096_v36 = vpop.permute.xlu1 %1050 }
 0x140   :  { %2994 = vmatprep.subr.bf16.mxu0 %v853_v29 }
 0x143   :  { %2995 = vmatpush3.bf16.msra.mxu0 %v853_v29  ;;  %v4098_v62 = vpop.permute.xlu0 %1055  ;;  %v4103_v13 = vpop.permute.xlu1 %1060  ;;  %v3171_v29 = vld [vmem:[%s4474_s3 + $0x218] ss:$12 sps:$4 sm:$0xff]  }
 0x144   :  { %2996 = vmatprep.subr.bf16.mxu0 %v852_v2 }
 0x145   :  { %1684 = vmatmul.mubr.bf16.gmra.mxu1 %v3092_v18  ;;  %v3144_v18 = vld [vmem:[%s4474_s3 + $0x168] ss:$12 sps:$4 sm:$0xff]  }
 0x146   :  { %1691 = vmatprep.mubr.bf16.mxu1 %v3093_v3  ;;  %v3173_v3 = vld [vmem:[%s4474_s3 + $0x230] ss:$12 sps:$4 sm:$0xff]  }
 0x147   :  { %2997 = vmatpush3.bf16.msra.mxu0 %v852_v2  ;;  %v4114_v44 = vpop.permute.xlu0 %1065  ;;  %v4116_v48 = vpop.permute.xlu1 %1070 }
 0x148   :  { %2998 = vmatprep.subr.bf16.mxu0 %v851_v38 }
 0x14b   :  { %2999 = vmatpush3.bf16.msra.mxu0 %v851_v38  ;;  %v4121_v2 = vpop.permute.xlu0 %1075  ;;  %v4129_v54 = vpop.permute.xlu1 %1080 }
 0x14d   :  { %1692 = vmatmul.mubr.bf16.gmra.mxu1 %v3095_v12  ;;  %v3148_v12 = vld [vmem:[%s4474_s3 + $0x180] ss:$12 sps:$4 sm:$0xff]  }
 0x14e   :  { %3001 = vmatmul.mubr.bf16.vlgmr.msra.gmra.mxu0 %v3097_v27  ;;  %1699 = vmatprep.mubr.bf16.mxu1 %v3098_v35  ;;  %v3150_v27 = vld [vmem:[%s4474_s3 + $0x19c] ss:$12 sps:$4 sm:$0xff]  }
 0x14f   :  { %3004 = vmatprep.mubr.bf16.mxu0 %v3101_v39  ;;  %v4131_v38 = vpop.permute.xlu0 %1085  ;;  %v4139_v35 = vpop.permute.xlu1 %1090 }
 0x153   :  { %v4141_v39 = vpop.permute.xlu0 %1095 }
 0x155   :  { %1700 = vmatmul.mubr.bf16.gmra.mxu1 %v3100_v51  ;;  %v3152_v51 = vld [vmem:[%s4474_s3 + $0x198] ss:$12 sps:$4 sm:$0xff]  }
 0x156   :  { %3005 = vmatmul.mubr.bf16.gmra.mxu0 %v3102_v43  ;;  %1707 = vmatprep.mubr.bf16.mxu1 %v3103_v17  ;;  %v4146_v43 = vpop.permute.xlu1 %1100  ;;  %v3153_v17 = vld [vmem:[%s4474_s3 + $0x1b4] ss:$12 sps:$4 sm:$0xff]  }
 0x157   :  { %3008 = vmatprep.mubr.bf16.mxu0 %v3106_v8  ;;  %v4151_v8 = vpop.permute.xlu0 %1105 }
 0x15d   :  { %1708 = vmatmul.mubr.bf16.gmra.mxu1 %v3105_v25  ;;  %v4153_v25 = vpop.permute.xlu1 %1110 }
 0x15e   :  { %3009 = vmatmul.mubr.bf16.gmra.mxu0 %v3107_v42  ;;  %1715 = vmatprep.mubr.bf16.mxu1 %v3108_v49  ;;  %v3156_v42 = vld [vmem:[%s4474_s3 + $0x1b0] ss:$12 sps:$4 sm:$0xff]   ;;  %v4158_v49 = vpop.permute.xlu0 %1115 }
 0x15f   :  { %3012 = vmatprep.mubr.bf16.mxu0 %v3111_v50  ;;  %v3158_v50 = vld [vmem:[%s4474_s3 + $0x1cc] ss:$12 sps:$4 sm:$0xff]  }
 0x165   :  { %1716 = vmatmul.mubr.bf16.gmra.mxu1 %v3110_v31  ;;  %v4163_v31 = vpop.permute.xlu1 %1120 }
 0x166   :  { %3013 = vmatmul.mubr.bf16.gmra.mxu0 %v3112_v26  ;;  %1723 = vmatprep.mubr.bf16.mxu1 %v3113_v30  ;;  %v4165_v26 = vpop.permute.xlu0 %1125  ;;  %v3160_v30 = vld [vmem:[%s4474_s3 + $0x1c8] ss:$12 sps:$4 sm:$0xff]  }
 0x167   :  { %3016 = vmatprep.mubr.bf16.mxu0 %v3116_v52  ;;  %v3161_v52 = vld [vmem:[%s4474_s3 + $0x1e4] ss:$12 sps:$4 sm:$0xff]  }
 0x16d   :  { %1724 = vmatmul.mubr.bf16.gmra.mxu1 %v3115_v45  ;;  %v4173_v45 = vpop.permute.xlu1 %1130 }
 0x16e   :  { %3017 = vmatmul.mubr.bf16.gmra.mxu0 %v3117_v20  ;;  %1731 = vmatprep.mubr.bf16.mxu1 %v3118_v32  ;;  %v4175_v20 = vpop.permute.xlu0 %1135  ;;  %v3164_v32 = vld [vmem:[%s4474_s3 + $0x1e0] ss:$12 sps:$4 sm:$0xff]  }
 0x16f   :  { %3020 = vmatprep.mubr.bf16.mxu0 %v3123_v7 }
 0x171   :  { %v4180_v7 = vpop.permute.xlu1 %1140 }
 0x175   :  { %1732 = vmatmul.mubr.bf16.gmra.mxu1 %v3120_v19  ;;  %v3166_v19 = vld [vmem:[%s4474_s3 + $0x1fc] ss:$12 sps:$4 sm:$0xff]  }
 0x176   :  { %1739 = vmatprep.mubr.bf16.mxu1 %v3121_v46  ;;  %3021 = vmatmul.mubr.bf16.gmra.mxu0 %v3125_v5  ;;  %v4185_v46 = vpop.permute.xlu0 %1145  ;;  %v4187_v5 = vpop.permute.xlu1 %1150 }
 0x177   :  { %3024 = vmatprep.mubr.bf16.mxu0 %v3131_v60  ;;  %v3168_v60 = vld [vmem:[%s4474_s3 + $0x1f8] ss:$12 sps:$4 sm:$0xff]  }
 0x17d   :  { %1740 = vmatmul.mubr.bf16.gmra.mxu1 %v3124_v4  ;;  %v4192_v4 = vpop.permute.xlu0 %1155 }
 0x17e   :  { %1747 = vmatprep.mubr.bf16.mxu1 %v3126_v53  ;;  %3025 = vmatmul.mubr.bf16.gmra.mxu0 %v3133_v58  ;;  %v3169_v53 = vld [vmem:[%s4474_s3 + $0x214] ss:$12 sps:$4 sm:$0xff]   ;;  %v4197_v58 = vpop.permute.xlu1 %1160 }
 0x17f   :  { %3028 = vmatprep.mubr.bf16.mxu0 %v3139_v41 }
 0x181   :  { %v4199_v41 = vpop.permute.xlu0 %1165 }
 0x182   :  { %4479 = vst [vmem:[#allocation6_spill] sm:$0xff] %v4199_v41 }
 0x185   :  { %1748 = vmatmul.mubr.bf16.gmra.mxu1 %v3128_v15  ;;  %v3172_v15 = vld [vmem:[%s4474_s3 + $0x210] ss:$12 sps:$4 sm:$0xff]  }
 0x186   :  { %1755 = vmatprep.mubr.bf16.mxu1 %v3129_v47  ;;  %3029 = vmatmul.mubr.bf16.gmra.mxu0 %v3141_v22  ;;  %v3174_v47 = vld [vmem:[%s4474_s3 + $0x22c] ss:$12 sps:$4 sm:$0xff]   ;;  %v4207_v22 = vpop.permute.xlu1 %1170 }
 0x187   :  { %3032 = vmatprep.mubr.bf16.mxu0 %v3147_v57  ;;  %4480 = vst [vmem:[#allocation7_spill] sm:$0xff] %v4207_v22  ;;  %v4209_v57 = vpop.permute.xlu0 %1175 }
 0x188   :  { %4481 = vst [vmem:[#allocation8_spill] sm:$0xff] %v4209_v57 }
 0x18d   :  { %1756 = vmatmul.mubr.bf16.gmra.mxu1 %v3132_v0  ;;  %v3176_v0 = vld [vmem:[%s4474_s3 + $0x228] ss:$12 sps:$4 sm:$0xff]   ;;  %s3200_s3 = smov [#allocation3]  }
 0x18e   :  { %1763 = vmatprep.mubr.bf16.mxu1 %v3134_v28  ;;  %3033 = vmatmul.mubr.bf16.gmra.mxu0 %v3149_v33  ;;  %v4214_v28 = vpop.permute.xlu1 %1180  ;;  %v4216_v33 = vpop.permute.xlu0 %1185  ;;  %s2630_s29 = sshll.u32 %s3200_s3, 4  ;;  %s2631_s29 = int_to_ptr.vmem [resolvable:$true] %s2630_s29 }
 0x18f   :  { %3036 = vmatprep.mubr.bf16.mxu0 %v3155_v37  ;;  %4482 = vst [vmem:[#allocation9_spill] sm:$0xff] %v4214_v28  ;;  %4483 = vst [vmem:[#allocation10_spill] sm:$0xff] %v4216_v33  ;;  %s3177_s1 = scalar_lea.vmem %s2631_s29, 16  ;;  %s3181_s30 = scalar_lea.vmem %s2631_s29, 32 }
 0x190   :  { %p3178_p0 = scmp.ne.s32.totalorder %s2631_s29, %s3177_s1  ;;  %p3182_p1 = scmp.lt.s32.totalorder %s2631_s29, %s2631_s29 }
 0x191   :  { %p3183_p2 = scmp.lt.s32.totalorder %s3181_s30, %s3177_s1 }
 0x192   :  { %v4218_v37 = vpop.permute.xlu1 %1190 }
 0x193   :  { %4484 = vst [vmem:[#allocation11_spill] sm:$0xff] %v4218_v37  ;;  %p3184_p3 = por %p3183_p2, %p3182_p1 }
 0x195   :  { %1764 = vmatmul.mubr.bf16.gmra.mxu1 %v3136_v24  ;;  %v4220_v24 = vpop.permute.xlu0 %1195  ;;  %p3185_p4 = pnand %p3184_p3, %p3178_p0 }
 0x196   :  { %1771 = vmatprep.mubr.bf16.mxu1 %v3137_v23  ;;  %3037 = vmatmul.mubr.bf16.gmra.mxu0 %v3157_v21  ;;  %4485 = vst [vmem:[#allocation12_spill] sm:$0xff] %v4220_v24  ;;  %v4222_v21 = vpop.permute.xlu1 %1200 }
 0x197   :  { %3040 = vmatprep.mubr.bf16.mxu0 %v3163_v6  ;;  %4486 = vst [vmem:[#allocation13_spill] sm:$0xff] %v4222_v21 }
 0x19d   :  { %1772 = vmatmul.mubr.bf16.gmra.mxu1 %v3140_v14  ;;  %v4224_v14 = vpop.permute.xlu0 %1205 }
 0x19e   :  { %1779 = vmatprep.mubr.bf16.mxu1 %v3142_v16  ;;  %3041 = vmatmul.mubr.bf16.gmra.mxu0 %v3165_v61  ;;  %4487 = vst [vmem:[#allocation14_spill] sm:$0xff] %v4224_v14 }
 0x19f   :  { %3044 = vmatprep.mubr.bf16.mxu0 %v3171_v29  ;;  %v4226_v29 = vpop.permute.xlu1 %1210 }
 0x1a0   :  { %4488 = vst [vmem:[#allocation15_spill] sm:$0xff] %v4226_v29 }
 0x1a5   :  { %1780 = vmatmul.mubr.bf16.gmra.mxu1 %v3144_v18 }
 0x1a6   :  { %1787 = vmatprep.mubr.bf16.mxu1 %v3145_v10  ;;  %3045 = vmatmul.mubr.bf16.gmra.mxu0 %v3173_v3  ;;  %v4228_v10 = vpop.permute.xlu0 %1215 }
 0x1a7   :  { %4489 = vst [vmem:[#allocation16_spill] sm:$0xff] %v4228_v10 }
 0x1ad   :  { %1788 = vmatmul.mubr.bf16.gmra.mxu1 %v3148_v12 }
 0x1ae   :  { %1795 = vmatprep.mubr.bf16.mxu1 %v3150_v27  ;;  %v4230_v27 = vpop.permute.xlu1 %1220 }
 0x1af   :  { %4490 = vst [vmem:[#allocation17_spill] sm:$0xff] %v4230_v27 }
 0x1b5   :  { %1796 = vmatmul.mubr.bf16.gmra.mxu1 %v3152_v51 }
 0x1b6   :  { %1803 = vmatprep.mubr.bf16.mxu1 %v3153_v17  ;;  %v4232_v17 = vpop.permute.xlu0 %1225 }
 0x1b7   :  { %4491 = vst [vmem:[#allocation18_spill] sm:$0xff] %v4232_v17 }
 0x1bd   :  { %1804 = vmatmul.mubr.bf16.gmra.mxu1 %v3156_v42 }
 0x1be   :  { %1811 = vmatprep.mubr.bf16.mxu1 %v3158_v50 }
 0x1c5   :  { %1812 = vmatmul.mubr.bf16.gmra.mxu1 %v3160_v30  ;;  %v4234_v30 = vpop.permute.xlu1 %1230 }
 0x1c6   :  { %1819 = vmatprep.mubr.bf16.mxu1 %v3161_v52  ;;  %4492 = vst [vmem:[#allocation19_spill] sm:$0xff] %v4234_v30 }
 0x1cd   :  { %1820 = vmatmul.mubr.bf16.gmra.mxu1 %v3164_v32  ;;  %v4236_v32 = vpop.permute.xlu0 %1235 }
 0x1ce   :  { %1827 = vmatprep.mubr.bf16.mxu1 %v3166_v19  ;;  %4493 = vst [vmem:[#allocation20_spill] sm:$0xff] %v4236_v32 }
 0x1d5   :  { %1828 = vmatmul.mubr.bf16.gmra.mxu1 %v3168_v60 }
 0x1d6   :  { %1835 = vmatprep.mubr.bf16.mxu1 %v3169_v53  ;;  %v4238_v53 = vpop.permute.xlu1 %1240 }
 0x1d7   :  { %4494 = vst [vmem:[#allocation21_spill] sm:$0xff] %v4238_v53 }
 0x1dd   :  { %1836 = vmatmul.mubr.bf16.gmra.mxu1 %v3172_v15 }
 0x1de   :  { %1843 = vmatprep.mubr.bf16.mxu1 %v3174_v47  ;;  %v3054_v47 = vpop.permute.xlu0 %3053 }
 0x1df   :  { %v3055_v33 = vunpack.i.l.bf16 %v3054_v47 }
 0x1e5   :  { %1844 = vmatmul.mubr.bf16.gmra.mxu1 %v3176_v0 }
 0x1ed   :  { %v1661_v23 = vpop.f32.mrf.mxu1 }
 0x1ee   :  { %v1662_v17 = vadd.f32 %v1661_v23, %v4030_v9 }
 0x1ef   :  { %v1663_v6 = vpop.f32.mrf.mxu1 }
 0x1f1   :  { %v1664_v16 = vpop.f32.mrf.mxu1 }
 0x1f3   :  { %v1666_v61 = vpop.f32.mrf.mxu1 }
 0x1f4   :  { %v2234_v61 = vpop.permute.xlu1 %2233 }
 0x1f5   :  { %v1669_v18 = vpop.f32.mrf.mxu1 }
 0x1f7   :  { %v1671_v3 = vpop.f32.mrf.mxu1 }
 0x1f9   :  { %v1672_v12 = vpop.f32.mrf.mxu1 }
 0x1fa   :  { %v1673_v32 = vadd.f32 %v1672_v12, %v4051_v55 }
 0x1fb   :  { %v1674_v51 = vpop.f32.mrf.mxu1 }
 0x1fc   :  { %v2239_v51 = vpop.permute.xlu0 %2238 }
 0x1fd   :  { %v1677_v42 = vpop.f32.mrf.mxu1 }
 0x1ff   :  { %v1679_v50 = vpop.f32.mrf.mxu1 }
 0x200   :  { %v1670_v50 = vadd.f32 %v1669_v18, %v4046_v34  ;;  %v2249_v28 = vpop.permute.xlu0 %2248 }
 0x201   :  { %v1680_v52 = vpop.f32.mrf.mxu1 }
 0x203   :  { %v1682_v19 = vpop.f32.mrf.mxu1 }
 0x205   :  { %v1685_v60 = vpop.f32.mrf.mxu1 }
 0x206   :  { %v1686_v12 = vadd.f32 %v1685_v60, %v4069_v56 }
 0x207   :  { %v1687_v15 = vpop.f32.mrf.mxu1 }
 0x208   :  { %v2244_v15 = vpop.permute.xlu1 %2243 }
 0x209   :  { %v1688_v0 = vpop.f32.mrf.mxu1 }
 0x20b   :  { %v1690_v6 = vpop.f32.mrf.mxu1 }
 0x20c   :  { %v1665_v6 = vadd.f32 %v1664_v16, %v4044_v40  ;;  %v2254_v40 = vpop.permute.xlu1 %2253  ;;  %v1689_v16 = vadd.f32 %v1688_v0, %v4080_v1 }
 0x20d   :  { %v1693_v3 = vpop.f32.mrf.mxu1 }
 0x20e   :  { %v3002_v27 = vpop.f32.mrf.mxu0 }
 0x20f   :  { %v1695_v30 = vpop.f32.mrf.mxu1  ;;  %v1895_v19 = vadd.f32 %v3002_v27, %v1670_v50 }
 0x210   :  { %v1886_v10 = vpop.f32.mrf.mxu0  ;;  %v3056_v30 = vunpack.i.h.bf16 %v3054_v47  ;;  %v2259_v47 = vpop.permute.xlu0 %2258 }
 0x211   :  { %v1887_v29 = vadd.f32 %v1886_v10, %v1662_v17  ;;  %v4243_v14 = vpop.f32.mrf.mxu1  ;;  %v2079_v23 = vmax.f32 %v1895_v19, 0.0  ;;  %v1678_v10 = vadd.f32 %v1677_v42, %v4062_v59 }
 0x212   :  { %v3003_v53 = vpop.f32.mrf.mxu0 }
 0x213   :  { %v2077_v21 = vmax.f32 %v1887_v29, 0.0  ;;  %v1898_v24 = vadd.f32 %v3003_v53, %v1673_v32  ;;  %v1698_v37 = vpop.f32.mrf.mxu1  ;;  %v2463_v29 = vmul.f32 %v2234_v61, %v2079_v23 }
 0x214   :  { %v1889_v9 = vpop.f32.mrf.mxu0 }
 0x215   :  { %v1890_v34 = vadd.f32 %v1889_v9, %v1665_v6  ;;  %v1701_v18 = vpop.f32.mrf.mxu1  ;;  %v2461_v57 = vmul.f32 %v3055_v33, %v2077_v21  ;;  %v2080_v27 = vmax.f32 %v1898_v24, 0.0  ;;  %v1681_v33 = vadd.f32 %v1680_v52, %v4064_v63 }
 0x216   :  { %v3006_v55 = vpop.f32.mrf.mxu0  ;;  %v2513_v61 = vsel %vm2509_vm1, %v2463_v29, 0.0  ;;  %v1702_v63 = vadd.f32 %v1701_v18, %v4098_v62  ;;  %v1694_v52 = vadd.f32 %v1693_v3, %v4082_v11  ;;  %v1697_v11 = vadd.f32 %v4243_v14, %v4096_v36 }
 0x217   :  { %v2078_v17 = vmax.f32 %v1890_v34, 0.0  ;;  %v1703_v50 = vpop.f32.mrf.mxu1  ;;  %v1911_v53 = vadd.f32 %v3006_v55, %v1686_v12  ;;  %v2510_v59 = vsel %vm2509_vm1, %v2461_v57, 0.0  ;;  %v2464_v56 = vmul.f32 %v2239_v51, %v2080_v27 }
 0x218   :  { %v1902_v37 = vpop.f32.mrf.mxu0 }
 0x219   :  { %v2462_v32 = vmul.f32 %v3056_v30, %v2078_v17  ;;  %v1903_v19 = vadd.f32 %v1902_v37, %v1678_v10  ;;  %v1704_v6 = vpop.f32.mrf.mxu1  ;;  %v2083_v23 = vmax.f32 %v1911_v53, 0.0  ;;  %v2264_v10 = vpop.permute.xlu1 %2263  ;;  %v2515_v51 = vsel %vm2509_vm1, %v2464_v56, 0.0 }
 0x21a   :  { %v3007_v21 = vpop.f32.mrf.mxu0  ;;  %v1705_v29 = vadd.f32 %v1704_v6, %v4103_v13 }
 0x21b   :  { %v2511_v24 = vsel %vm2509_vm1, %v2462_v32, 0.0  ;;  %v2081_v42 = vmax.f32 %v1903_v19, 0.0  ;;  %v1914_v60 = vadd.f32 %v3007_v21, %v1689_v16  ;;  %v1706_v9 = vpop.f32.mrf.mxu1  ;;  %v2269_v16 = vpop.permute.xlu0 %2268  ;;  %v2467_v53 = vmul.f32 %v2254_v40, %v2083_v23 }
 0x21c   :  { %v2512_v1 = vadd.f32 %v2511_v24, %v2510_v59  ;;  %v1905_v0 = vpop.f32.mrf.mxu0 }
 0x21d   :  { %v2465_v34 = vmul.f32 %v2244_v15, %v2081_v42  ;;  %v1906_v30 = vadd.f32 %v1905_v0, %v1681_v33  ;;  %v1709_v55 = vpop.f32.mrf.mxu1  ;;  %v2084_v27 = vmax.f32 %v1914_v60, 0.0  ;;  %v2274_v13 = vpop.permute.xlu1 %2273 }
 0x21e   :  { %v2514_v12 = vadd.f32 %v2513_v61, %v2512_v1  ;;  %v3010_v57 = vpop.f32.mrf.mxu0  ;;  %v2521_v1 = vsel %vm2509_vm1, %v2467_v53, 0.0 }
 0x21f   :  { %v2082_v17 = vmax.f32 %v1906_v30, 0.0  ;;  %v1711_v50 = vpop.f32.mrf.mxu1  ;;  %v1927_v32 = vadd.f32 %v3010_v57, %v1702_v63  ;;  %v2517_v19 = vsel %vm2509_vm1, %v2465_v34, 0.0  ;;  %v2468_v21 = vmul.f32 %v2259_v47, %v2084_v27  ;;  %v2279_v23 = vpop.permute.xlu0 %2278 }
 0x220   :  { %v2516_v37 = vadd.f32 %v2515_v51, %v2514_v12  ;;  %v1918_v15 = vpop.f32.mrf.mxu0  ;;  %v1710_v30 = vadd.f32 %v1709_v55, %v4114_v44 }
 0x221   :  { %v2466_v33 = vmul.f32 %v2249_v28, %v2082_v17  ;;  %v1919_v59 = vadd.f32 %v1918_v15, %v1694_v52  ;;  %v1712_v62 = vpop.f32.mrf.mxu1  ;;  %v2087_v9 = vmax.f32 %v1927_v32, 0.0  ;;  %v2523_v47 = vsel %vm2509_vm1, %v2468_v21, 0.0  ;;  %v2284_v32 = vpop.permute.xlu1 %2283 }
 0x222   :  { %v2518_v3 = vadd.f32 %v2517_v19, %v2516_v37  ;;  %v3011_v18 = vpop.f32.mrf.mxu0  ;;  %v1713_v19 = vadd.f32 %v1712_v62, %v4116_v48 }
 0x223   :  { %v2519_v56 = vsel %vm2509_vm1, %v2466_v33, 0.0  ;;  %v2085_v24 = vmax.f32 %v1919_v59, 0.0  ;;  %v1930_v42 = vadd.f32 %v3011_v18, %v1705_v29  ;;  %v1714_v60 = vpop.f32.mrf.mxu1  ;;  %v2471_v52 = vmul.f32 %v2274_v13, %v2087_v9 }
 0x224   :  { %v2520_v6 = vadd.f32 %v2519_v56, %v2518_v3  ;;  %v1921_v40 = vpop.f32.mrf.mxu0 }
 0x225   :  { %v2469_v28 = vmul.f32 %v2264_v10, %v2085_v24  ;;  %v1922_v0 = vadd.f32 %v1921_v40, %v1697_v11  ;;  %v1717_v61 = vpop.f32.mrf.mxu1  ;;  %v2088_v12 = vmax.f32 %v1930_v42, 0.0  ;;  %v2289_v11 = vpop.permute.xlu0 %2288 }
 0x226   :  { %v2522_v34 = vadd.f32 %v2521_v1, %v2520_v6  ;;  %v1718_v36 = vadd.f32 %v1717_v61, %v4121_v2  ;;  %v3014_v14 = vpop.f32.mrf.mxu0  ;;  %v2294_v9 = vpop.permute.xlu1 %2293 }
 0x227   :  { %v2086_v63 = vmax.f32 %v1922_v0, 0.0  ;;  %v1719_v57 = vpop.f32.mrf.mxu1  ;;  %v2525_v17 = vsel %vm2509_vm1, %v2469_v28, 0.0  ;;  %v2472_v44 = vmul.f32 %v2279_v23, %v2088_v12 }
 0x228   :  { %v2524_v51 = vadd.f32 %v2523_v47, %v2522_v34  ;;  %v1934_v27 = vpop.f32.mrf.mxu0  ;;  %v1943_v50 = vadd.f32 %v3014_v14, %v1718_v36 }
 0x229   :  { %v2470_v10 = vmul.f32 %v2269_v16, %v2086_v63  ;;  %v1935_v37 = vadd.f32 %v1934_v27, %v1710_v30  ;;  %v1720_v29 = vpop.f32.mrf.mxu1  ;;  %v2529_v16 = vsel %vm2509_vm1, %v2471_v52, 0.0  ;;  %v2531_v13 = vsel %vm2509_vm1, %v2472_v44, 0.0  ;;  %v2299_v23 = vpop.permute.xlu0 %2298 }
 0x22a   :  { %v2526_v15 = vadd.f32 %v2525_v17, %v2524_v51  ;;  %v1721_v2 = vadd.f32 %v1720_v29, %v4129_v54  ;;  %v3015_v53 = vpop.f32.mrf.mxu0  ;;  %v2091_v56 = vmax.f32 %v1943_v50, 0.0 }
 0x22b   :  { %v2527_v55 = vsel %vm2509_vm1, %v2470_v10, 0.0  ;;  %v2089_v33 = vmax.f32 %v1935_v37, 0.0  ;;  %v1722_v59 = vpop.f32.mrf.mxu1 }
 0x22c   :  { %v2528_v3 = vadd.f32 %v2527_v55, %v2526_v15  ;;  %v1946_v18 = vadd.f32 %v3015_v53, %v1721_v2  ;;  %v1937_v21 = vpop.f32.mrf.mxu0  ;;  %v2475_v1 = vmul.f32 %v2294_v9, %v2091_v56 }
 0x22d   :  { %v2473_v24 = vmul.f32 %v2284_v32, %v2089_v33  ;;  %v1938_v42 = vadd.f32 %v1937_v21, %v1713_v19  ;;  %v4270_v60 = vpop.f32.mrf.mxu1 }
 0x22e   :  { %v2530_v54 = vadd.f32 %v2529_v16, %v2528_v3  ;;  %v2092_v48 = vmax.f32 %v1946_v18, 0.0  ;;  %v2537_v12 = vsel %vm2509_vm1, %v2475_v1, 0.0  ;;  %v4276_v63 = vpop.f32.mrf.mxu0 }
 0x22f   :  { %v2090_v62 = vmax.f32 %v1938_v42, 0.0  ;;  %v1727_v6 = vpop.f32.mrf.mxu1  ;;  %v2533_v28 = vsel %vm2509_vm1, %v2473_v24, 0.0  ;;  %v2304_v24 = vpop.permute.xlu1 %2303 }
 0x230   :  { %v2532_v40 = vadd.f32 %v2531_v13, %v2530_v54  ;;  %v2476_v36 = vmul.f32 %v2299_v23, %v2092_v48  ;;  %v1950_v10 = vpop.f32.mrf.mxu0  ;;  %v2309_v13 = vpop.permute.xlu0 %2308 }
 0x231   :  { %v2474_v0 = vmul.f32 %v2289_v11, %v2090_v62  ;;  %v1728_v61 = vpop.f32.mrf.mxu1 }
 0x232   :  { %v2534_v34 = vadd.f32 %v2533_v28, %v2532_v40  ;;  %v2539_v51 = vsel %vm2509_vm1, %v2476_v36, 0.0  ;;  %v3019_v29 = vpop.f32.mrf.mxu0 }
 0x233   :  { %v2535_v14 = vsel %vm2509_vm1, %v2474_v0, 0.0  ;;  %v1730_v47 = vpop.f32.mrf.mxu1  ;;  %v2314_v9 = vpop.permute.xlu1 %2313 }
 0x234   :  { %v2536_v30 = vadd.f32 %v2535_v14, %v2534_v34  ;;  %v1953_v2 = vpop.f32.mrf.mxu0  ;;  %v2319_v1 = vpop.permute.xlu0 %2318 }
 0x235   :  { %v1733_v57 = vpop.f32.mrf.mxu1 }
 0x236   :  { %v2538_v52 = vadd.f32 %v2537_v12, %v2536_v30  ;;  %v4281_v19 = vpop.f32.mrf.mxu0 }
 0x237   :  { %v1735_v27 = vpop.f32.mrf.mxu1  ;;  %v4299_v34 = vpop.permute.xlu1 %2323 }
 0x238   :  { %v4279_v17 = vadd.f32 %v2539_v51, %v2538_v52  ;;  %v1966_v33 = vpop.f32.mrf.mxu0  ;;  %v4305_v47 = vpop.permute.xlu0 %2328  ;;  %v1726_v52 = vadd.f32 %v4270_v60, %v4131_v38  ;;  %v1729_v51 = vadd.f32 %v1728_v61, %v4139_v35 }
 0x239   :  { %v1736_v50 = vpop.f32.mrf.mxu1 }
 0x23a   :  { %v4283_v3 = vpop.f32.mrf.mxu0  ;;  %v1737_v61 = vadd.f32 %v1736_v50, %v4146_v43 }
 0x23b   :  { %v1738_v37 = vpop.f32.mrf.mxu1 }
 0x23c   :  { %v1969_v16 = vpop.f32.mrf.mxu0  ;;  %v4314_v37 = vpop.permute.xlu1 %2333 }
 0x23d   :  { %v1741_v32 = vpop.f32.mrf.mxu1 }
 0x23e   :  { %v4287_v42 = vpop.f32.mrf.mxu0 }
 0x23f   :  { %v1743_v15 = vpop.f32.mrf.mxu1 }
 0x240   :  { %v4291_v62 = vpop.f32.mrf.mxu0  ;;  %v4325_v60 = vpop.permute.xlu1 %2343 }
 0x241   :  { %v1744_v53 = vpop.f32.mrf.mxu1 }
 0x242   :  { %v4295_v28 = vpop.f32.mrf.mxu0 }
 0x243   :  { %v1746_v44 = vpop.f32.mrf.mxu1 }
 0x244   :  { %v4301_v36 = vpop.f32.mrf.mxu0  ;;  %v4341_v50 = vpop.permute.xlu1 %2353 }
 0x245   :  { %v1749_v55 = vpop.f32.mrf.mxu1 }
 0x246   :  { %v4307_v30 = vpop.f32.mrf.mxu0 }
 0x247   :  { %v1751_v59 = vpop.f32.mrf.mxu1 }
 0x248   :  { %v4316_v15 = vpop.f32.mrf.mxu0  ;;  %v4318_v59 = vpop.permute.xlu0 %2338 }
 0x249   :  { %v1752_v11 = vpop.f32.mrf.mxu1 }
 0x24b   :  { %v1754_v18 = vpop.f32.mrf.mxu1 }
 0x24c   :  { %v1951_v18 = vadd.f32 %v1950_v10, %v1726_v52 }
 0x24d   :  { %v4285_v21 = vpop.f32.mrf.mxu1 }
 0x24e   :  { %v2093_v35 = vmax.f32 %v1951_v18, 0.0 }
 0x24f   :  { %v1759_v56 = vpop.f32.mrf.mxu1 }
 0x250   :  { %v1954_v56 = vadd.f32 %v1953_v2, %v1729_v51  ;;  %v1742_v2 = vadd.f32 %v1741_v32, %v4151_v8  ;;  %v1962_v51 = vadd.f32 %v3019_v29, %v1737_v61  ;;  %v1753_v8 = vadd.f32 %v1752_v11, %v4163_v31 }
 0x251   :  { %v4289_v54 = vpop.f32.mrf.mxu1  ;;  %v1758_v31 = vadd.f32 %v4285_v21, %v4165_v26 }
 0x252   :  { %v1967_v41 = vadd.f32 %v1966_v33, %v1742_v2 }
 0x253   :  { %v1762_v48 = vpop.f32.mrf.mxu1 }
 0x255   :  { %v4293_v6 = vpop.f32.mrf.mxu1 }
 0x257   :  { %v1767_v40 = vpop.f32.mrf.mxu1 }
 0x258   :  { %v1734_v40 = vadd.f32 %v1733_v57, %v4141_v39  ;;  %v2477_v57 = vmul.f32 %v2304_v24, %v2093_v35  ;;  %v2096_v24 = vmax.f32 %v1962_v51, 0.0 }
 0x259   :  { %v4297_v0 = vpop.f32.mrf.mxu1 }
 0x25a   :  { %v1959_v10 = vadd.f32 %v4276_v63, %v1734_v40  ;;  %v1750_v63 = vadd.f32 %v1749_v55, %v4158_v49  ;;  %v2541_v29 = vsel %vm2509_vm1, %v2477_v57, 0.0  ;;  %v1978_v55 = vadd.f32 %v4283_v3, %v1753_v8 }
 0x25b   :  { %v1770_v23 = vpop.f32.mrf.mxu1 }
 0x25c   :  { %v4323_v23 = vpop.f32.mrf.mxu0  ;;  %v1975_v49 = vadd.f32 %v4281_v19, %v1750_v63  ;;  %v2100_v57 = vmax.f32 %v1978_v55, 0.0 }
 0x25d   :  { %v4303_v14 = vpop.f32.mrf.mxu1  ;;  %4495 = vst [vmem:[#allocation22_spill] sm:$0xff] %v4323_v23 }
 0x25e   :  { %v4334_v52 = vpop.f32.mrf.mxu0  ;;  %v2099_v21 = vmax.f32 %v1975_v49, 0.0 }
 0x25f   :  { %v1775_v12 = vpop.f32.mrf.mxu1 }
 0x260   :  { %v2094_v12 = vmax.f32 %v1954_v56, 0.0  ;;  %v4339_v43 = vpop.f32.mrf.mxu0  ;;  %v2095_v56 = vmax.f32 %v1959_v10, 0.0  ;;  %v4358_v10 = vpop.permute.xlu1 %2363 }
 0x261   :  { %v4312_v27 = vpop.f32.mrf.mxu1 }
 0x262   :  { %v2478_v23 = vmul.f32 %v2309_v13, %v2094_v12  ;;  %v4350_v35 = vpop.f32.mrf.mxu0  ;;  %v2479_v33 = vmul.f32 %v2314_v9, %v2095_v56  ;;  %v2097_v12 = vmax.f32 %v1967_v41, 0.0  ;;  %v1766_v9 = vadd.f32 %v4293_v6, %v4175_v20 }
 0x263   :  { %v1778_v44 = vpop.f32.mrf.mxu1  ;;  %v1769_v6 = vadd.f32 %v4297_v0, %v4180_v7 }
 0x264   :  { %v4330_v44 = vpop.permute.xlu0 %2348  ;;  %v2543_v13 = vsel %vm2509_vm1, %v2478_v23, 0.0  ;;  %v1761_v23 = vadd.f32 %v4289_v54, %v4173_v45  ;;  %v4364_v41 = vpop.f32.mrf.mxu0  ;;  %v2545_v26 = vsel %vm2509_vm1, %v2479_v33, 0.0  ;;  %v2481_v3 = vmul.f32 %v4299_v34, %v2097_v12 }
 0x265   :  { %v4320_v48 = vpop.f32.mrf.mxu1  ;;  %v1991_v56 = vadd.f32 %v4287_v42, %v1766_v9  ;;  %v4381_v34 = vpop.permute.xlu1 %2373 }
 0x266   :  { %v1986_v20 = vadd.f32 %v4301_v36, %v1761_v23  ;;  %v2017_v63 = vpop.f32.mrf.mxu0 }
 0x267   :  { %v1783_v38 = vpop.f32.mrf.mxu1  ;;  %v2103_v12 = vmax.f32 %v1991_v56, 0.0 }
 0x268   :  { %v1745_v38 = vadd.f32 %v1744_v53, %v4153_v25  ;;  %v4345_v40 = vpop.permute.xlu0 %2358  ;;  %v2542_v53 = vadd.f32 %v2541_v29, %v4279_v17  ;;  %v4388_v0 = vpop.f32.mrf.mxu0 }
 0x269   :  { %v4328_v22 = vpop.f32.mrf.mxu1 }
 0x26a   :  { %v1970_v25 = vadd.f32 %v1969_v16, %v1745_v38  ;;  %v2480_v16 = vmul.f32 %v2319_v1, %v2096_v24  ;;  %v2544_v2 = vadd.f32 %v2543_v13, %v2542_v53  ;;  %v1983_v1 = vadd.f32 %v4291_v62, %v1758_v31 }
 0x26b   :  { %v1786_v39 = vpop.f32.mrf.mxu1  ;;  %v2549_v62 = vsel %vm2509_vm1, %v2481_v3, 0.0  ;;  %v2484_v24 = vmul.f32 %v4318_v59, %v2100_v57  ;;  %v2102_v53 = vmax.f32 %v1986_v20, 0.0  ;;  %v1994_v13 = vadd.f32 %v4295_v28, %v1769_v6  ;;  %v2030_v28 = vpop.f32.mrf.mxu0  ;;  %v4497_v57 = vld [vmem:[#allocation7_spill] sm:$0xff] }
 0x26c   :  { %v2098_v17 = vmax.f32 %v1970_v25, 0.0  ;;  %v4368_v39 = vpop.permute.xlu0 %2368  ;;  %v2547_v45 = vsel %vm2509_vm1, %v2480_v16, 0.0  ;;  %v2546_v38 = vadd.f32 %v2545_v26, %v2544_v2  ;;  %v2101_v29 = vmax.f32 %v1983_v1, 0.0 }
 0x26d   :  { %v4337_v18 = vpop.f32.mrf.mxu1  ;;  %v1782_v31 = vadd.f32 %v4320_v48, %v4192_v4  ;;  %v1785_v2 = vadd.f32 %v4328_v22, %v4197_v58 }
 0x26e   :  { %v2482_v54 = vmul.f32 %v4305_v47, %v2098_v17  ;;  %v1774_v47 = vadd.f32 %v4303_v14, %v4185_v46  ;;  %v2548_v36 = vadd.f32 %v2547_v45, %v2546_v38  ;;  %v2485_v14 = vmul.f32 %v4325_v60, %v2101_v29  ;;  %v2384_v17 = vpop.permute.xlu1 %2383 }
 0x26f   :  { %v1791_v32 = vpop.f32.mrf.mxu1  ;;  %v2007_v3 = vadd.f32 %v4307_v30, %v1782_v31 }
 0x270   :  { %v2483_v32 = vmul.f32 %v4314_v37, %v2099_v21  ;;  %v4390_v42 = vpop.permute.xlu0 %2378  ;;  %v2551_v25 = vsel %vm2509_vm1, %v2482_v54, 0.0  ;;  %v1777_v37 = vadd.f32 %v4312_v27, %v4187_v5  ;;  %v2550_v33 = vadd.f32 %v2549_v62, %v2548_v36  ;;  %v4496_v21 = vld [vmem:[#allocation6_spill] sm:$0xff] }
 0x271   :  { %v4352_v61 = vpop.f32.mrf.mxu1  ;;  %v1999_v59 = vadd.f32 %v4316_v15, %v1774_v47  ;;  %v2486_v5 = vmul.f32 %v4330_v44, %v2102_v53  ;;  %v2104_v27 = vmax.f32 %v1994_v13, 0.0  ;;  %v2487_v15 = vmul.f32 %v4341_v50, %v2103_v12  ;;  %v4498_v54 = vld [vmem:[#allocation22_spill] sm:$0xff] }
 0x272   :  { %v2553_v46 = vsel %vm2509_vm1, %v2483_v32, 0.0  ;;  %v2552_v55 = vadd.f32 %v2551_v25, %v2550_v33  ;;  %v2002_v23 = vadd.f32 %v4334_v52, %v1777_v37  ;;  %v2557_v4 = vsel %vm2509_vm1, %v2485_v14, 0.0  ;;  %v2394_v56 = vpop.permute.xlu1 %2393  ;;  %v4499_v32 = vld [vmem:[#allocation8_spill] sm:$0xff]  ;;  %v4500_v37 = vld [vmem:[#allocation9_spill] sm:$0xff]  ;;  %v4501_v12 = vld [vmem:[#allocation10_spill] sm:$0xff] }
 0x273   :  { %v1794_v11 = vpop.f32.mrf.mxu1  ;;  %v2105_v48 = vmax.f32 %v1999_v59, 0.0  ;;  %v1790_v1 = vadd.f32 %v4337_v18, %v4496_v21  ;;  %v1793_v52 = vadd.f32 %v4352_v61, %v4497_v57  ;;  %v2559_v22 = vsel %vm2509_vm1, %v2486_v5, 0.0  ;;  %v4503_v21 = vld [vmem:[#allocation12_spill] sm:$0xff] }
 0x274   :  { %v2555_v11 = vsel %vm2509_vm1, %v2484_v24, 0.0  ;;  %v2554_v60 = vadd.f32 %v2553_v46, %v2552_v55  ;;  %v2389_v26 = vpop.permute.xlu0 %2388  ;;  %v2488_v50 = vmul.f32 %v4345_v40, %v2104_v27  ;;  %v2106_v45 = vmax.f32 %v2002_v23, 0.0  ;;  %v4502_v27 = vld [vmem:[#allocation11_spill] sm:$0xff] }
 0x275   :  { %v4366_v19 = vpop.f32.mrf.mxu1  ;;  %v2010_v20 = vadd.f32 %v4498_v54, %v1785_v2  ;;  %v2561_v30 = vsel %vm2509_vm1, %v2487_v15, 0.0  ;;  %v2489_v18 = vmul.f32 %v4358_v10, %v2105_v48  ;;  %v2107_v62 = vmax.f32 %v2007_v3, 0.0 }
 0x276   :  { %v2556_v44 = vadd.f32 %v2555_v11, %v2554_v60  ;;  %v2015_v61 = vadd.f32 %v4350_v35, %v1790_v1  ;;  %v1798_v29 = vadd.f32 %v4366_v19, %v4499_v32  ;;  %v2018_v36 = vadd.f32 %v2017_v63, %v1793_v52 }
 0x277   :  { %v1799_v51 = vpop.f32.mrf.mxu1  ;;  %v2563_v25 = vsel %vm2509_vm1, %v2488_v50, 0.0  ;;  %v2490_v53 = vmul.f32 %v4368_v39, %v2106_v45  ;;  %v2108_v13 = vmax.f32 %v2010_v20, 0.0  ;;  %v2565_v19 = vsel %vm2509_vm1, %v2489_v18, 0.0 }
 0x278   :  { %v4413_v51 = vpop.f32.mrf.mxu0  ;;  %v2558_v6 = vadd.f32 %v2557_v4, %v2556_v44  ;;  %v2491_v63 = vmul.f32 %v4381_v34, %v2107_v62  ;;  %v2109_v59 = vmax.f32 %v2015_v61, 0.0  ;;  %v2023_v31 = vadd.f32 %v4339_v43, %v1798_v29 }
 0x279   :  { %v4379_v8 = vpop.f32.mrf.mxu1  ;;  %v2110_v11 = vmax.f32 %v2018_v36, 0.0  ;;  %v2567_v5 = vsel %vm2509_vm1, %v2490_v53, 0.0 }
 0x27a   :  { %v2560_v47 = vadd.f32 %v2559_v22, %v2558_v6  ;;  %v2033_v24 = vpop.f32.mrf.mxu0  ;;  %v1801_v33 = vadd.f32 %v4379_v8, %v4500_v37  ;;  %v2492_v8 = vmul.f32 %v4390_v42, %v2108_v13  ;;  %v2569_v48 = vsel %vm2509_vm1, %v2491_v63, 0.0  ;;  %v4504_v22 = vld [vmem:[#allocation13_spill] sm:$0xff] }
 0x27b   :  { %v1802_v7 = vpop.f32.mrf.mxu1  ;;  %v2493_v43 = vmul.f32 %v2384_v17, %v2109_v59  ;;  %v2111_v3 = vmax.f32 %v2023_v31, 0.0  ;;  %v2494_v57 = vmul.f32 %v2389_v26, %v2110_v11 }
 0x27c   :  { %v2399_v7 = vpop.permute.xlu0 %2398  ;;  %v2562_v10 = vadd.f32 %v2561_v30, %v2560_v47  ;;  %v4428_v14 = vpop.f32.mrf.mxu0  ;;  %v2571_v42 = vsel %vm2509_vm1, %v2492_v8, 0.0 }
 0x27d   :  { %v1805_v49 = vpop.f32.mrf.mxu1  ;;  %v2573_v6 = vsel %vm2509_vm1, %v2493_v43, 0.0  ;;  %v2495_v17 = vmul.f32 %v2394_v56, %v2111_v3  ;;  %v2575_v62 = vsel %vm2509_vm1, %v2494_v57, 0.0 }
 0x27e   :  { %v1806_v46 = vadd.f32 %v1805_v49, %v4501_v12  ;;  %v2564_v55 = vadd.f32 %v2563_v25, %v2562_v10  ;;  %v2026_v49 = vadd.f32 %v4364_v41, %v1801_v33  ;;  %v2046_v4 = vpop.f32.mrf.mxu0  ;;  %v4507_v10 = vld [vmem:[#allocation16_spill] sm:$0xff] }
 0x27f   :  { %v1807_v16 = vpop.f32.mrf.mxu1  ;;  %v2577_v56 = vsel %vm2509_vm1, %v2495_v17, 0.0 }
 0x280   :  { %v2404_v16 = vpop.permute.xlu1 %2403  ;;  %v2566_v2 = vadd.f32 %v2565_v19, %v2564_v55  ;;  %v2031_v60 = vadd.f32 %v2030_v28, %v1806_v46  ;;  %v2409_v34 = vpop.permute.xlu0 %2408 }
 0x281   :  { %v1808_v9 = vpop.f32.mrf.mxu1  ;;  %v3043_v54 = vpop.f32.mrf.mxu0 }
 0x282   :  { %v1809_v23 = vadd.f32 %v1808_v9, %v4502_v27  ;;  %v2568_v44 = vadd.f32 %v2567_v5, %v2566_v2  ;;  %v2113_v28 = vmax.f32 %v2031_v60, 0.0  ;;  %v4508_v27 = vld [vmem:[#allocation17_spill] sm:$0xff] }
 0x283   :  { %v1810_v58 = vpop.f32.mrf.mxu1  ;;  %v2049_v13 = vpop.f32.mrf.mxu0 }
 0x284   :  { %v2112_v58 = vmax.f32 %v2026_v49, 0.0  ;;  %v2034_v41 = vadd.f32 %v2033_v24, %v1809_v23  ;;  %v2570_v50 = vadd.f32 %v2569_v48, %v2568_v44  ;;  %v2414_v20 = vpop.permute.xlu1 %2413  ;;  %v2419_v32 = vpop.permute.xlu0 %2418  ;;  %v4506_v24 = vld [vmem:[#allocation15_spill] sm:$0xff]  ;;  %v2497_v53 = vmul.f32 %v2404_v16, %v2113_v28 }
 0x285   :  { %v1813_v38 = vpop.f32.mrf.mxu1  ;;  %v3046_v19 = vpop.f32.mrf.mxu0 }
 0x286   :  { %v1814_v1 = vadd.f32 %v1813_v38, %v4503_v21  ;;  %v4505_v38 = vld [vmem:[#allocation14_spill] sm:$0xff]  ;;  %v2572_v26 = vadd.f32 %v2571_v42, %v2570_v50  ;;  %v2496_v29 = vmul.f32 %v2399_v7, %v2112_v58  ;;  %v2114_v47 = vmax.f32 %v2034_v41, 0.0 }
 0x287   :  { %v1815_v40 = vpop.f32.mrf.mxu1  ;;  %v2581_v11 = vsel %vm2509_vm1, %v2497_v53, 0.0  ;;  %v4509_v42 = vld [vmem:[#allocation18_spill] sm:$0xff] }
 0x288   :  { %v2039_v30 = vadd.f32 %v4388_v0, %v1814_v1  ;;  %v2574_v25 = vadd.f32 %v2573_v6, %v2572_v26  ;;  %v2424_v63 = vpop.permute.xlu1 %2423  ;;  %v2579_v7 = vsel %vm2509_vm1, %v2496_v29, 0.0  ;;  %v2498_v59 = vmul.f32 %v2409_v34, %v2114_v47  ;;  %v2429_v16 = vpop.permute.xlu0 %2428 }
 0x289   :  { %v1816_v35 = vpop.f32.mrf.mxu1 }
 0x28a   :  { %v1817_v9 = vadd.f32 %v1816_v35, %v4504_v22  ;;  %v2115_v0 = vmax.f32 %v2039_v30, 0.0  ;;  %v2576_v46 = vadd.f32 %v2575_v62, %v2574_v25 }
 0x28b   :  { %v1818_v39 = vpop.f32.mrf.mxu1 }
 0x28c   :  { %v2042_v36 = vadd.f32 %v4413_v51, %v1817_v9  ;;  %v2578_v55 = vadd.f32 %v2577_v56, %v2576_v46  ;;  %v2499_v5 = vmul.f32 %v2414_v20, %v2115_v0  ;;  %v2434_v1 = vpop.permute.xlu1 %2433  ;;  %v2439_v20 = vpop.permute.xlu0 %2438  ;;  %v4511_v56 = vld [vmem:[#allocation20_spill] sm:$0xff] }
 0x28d   :  { %v1821_v15 = vpop.f32.mrf.mxu1 }
 0x28e   :  { %v1822_v18 = vadd.f32 %v1821_v15, %v4505_v38  ;;  %v2116_v51 = vmax.f32 %v2042_v36, 0.0  ;;  %v2580_v2 = vadd.f32 %v2579_v7, %v2578_v55  ;;  %v2062_v15 = vpop.f32.mrf.mxu0  ;;  %v2585_v44 = vsel %vm2509_vm1, %v2499_v5, 0.0  ;;  %v4512_v55 = vld [vmem:[#allocation21_spill] sm:$0xff] }
 0x28f   :  { %v1823_v52 = vpop.f32.mrf.mxu1 }
 0x290   :  { %v2047_v33 = vadd.f32 %v2046_v4, %v1822_v18  ;;  %v2583_v4 = vsel %vm2509_vm1, %v2498_v59, 0.0  ;;  %v2500_v48 = vmul.f32 %v2419_v32, %v2116_v51  ;;  %v2582_v3 = vadd.f32 %v2581_v11, %v2580_v2  ;;  %v3047_v22 = vpop.f32.mrf.mxu0  ;;  %v4510_v18 = vld [vmem:[#allocation19_spill] sm:$0xff] }
 0x291   :  { %v1824_v45 = vpop.f32.mrf.mxu1 }
 0x292   :  { %v1825_v40 = vadd.f32 %v1824_v45, %v4506_v24  ;;  %v2117_v8 = vmax.f32 %v2047_v33, 0.0  ;;  %v2587_v9 = vsel %vm2509_vm1, %v2500_v48, 0.0  ;;  %v2065_v32 = vpop.f32.mrf.mxu0  ;;  %v2444_v24 = vpop.permute.xlu1 %2443 }
 0x293   :  { %v1826_v61 = vpop.f32.mrf.mxu1  ;;  %v2449_v33 = vpop.permute.xlu0 %2448 }
 0x294   :  { %v2050_v31 = vadd.f32 %v2049_v13, %v1825_v40  ;;  %v2501_v57 = vmul.f32 %v2424_v63, %v2117_v8 }
 0x295   :  { %v1829_v37 = vpop.f32.mrf.mxu1 }
 0x296   :  { %v1830_v12 = vadd.f32 %v1829_v37, %v4507_v10  ;;  %v2118_v34 = vmax.f32 %v2050_v31, 0.0  ;;  %v2589_v17 = vsel %vm2509_vm1, %v2501_v57, 0.0 }
 0x297   :  { %v1831_v35 = vpop.f32.mrf.mxu1 }
 0x298   :  { %v2055_v49 = vadd.f32 %v4428_v14, %v1830_v12  ;;  %v2584_v14 = vadd.f32 %v2583_v4, %v2582_v3  ;;  %v2502_v50 = vmul.f32 %v2429_v16, %v2118_v34 }
 0x299   :  { %v1832_v39 = vpop.f32.mrf.mxu1 }
 0x29a   :  { %v1833_v23 = vadd.f32 %v1832_v39, %v4508_v27  ;;  %v2119_v52 = vmax.f32 %v2055_v49, 0.0  ;;  %v2586_v6 = vadd.f32 %v2585_v44, %v2584_v14  ;;  %v2591_v29 = vsel %vm2509_vm1, %v2502_v50, 0.0  ;;  %v2454_v39 = vpop.permute.xlu1 %2453 }
 0x29b   :  { %v1834_v60 = vpop.f32.mrf.mxu1 }
 0x29c   :  { %v2058_v43 = vadd.f32 %v3043_v54, %v1833_v23  ;;  %v2503_v30 = vmul.f32 %v2434_v1, %v2119_v52  ;;  %v2588_v62 = vadd.f32 %v2587_v9, %v2586_v6 }
 0x29d   :  { %v1837_v21 = vpop.f32.mrf.mxu1 }
 0x29e   :  { %v1838_v58 = vadd.f32 %v1837_v21, %v4509_v42  ;;  %v2120_v28 = vmax.f32 %v2058_v43, 0.0  ;;  %v2590_v40 = vadd.f32 %v2589_v17, %v2588_v62  ;;  %v2593_v53 = vsel %vm2509_vm1, %v2503_v30, 0.0 }
 0x29f   :  { %v1839_v41 = vpop.f32.mrf.mxu1  ;;  %v2617_v43 = vlaneseq }
 0x2a0   :  { %v2063_v45 = vadd.f32 %v2062_v15, %v1838_v58  ;;  %v2504_v47 = vmul.f32 %v2439_v20, %v2120_v28  ;;  %v2592_v10 = vadd.f32 %v2591_v29, %v2590_v40  ;;  %v2459_v15 = vpop.permute.xlu0 %2458  ;;  %v2615_v58 = vpop.permute.xlu1 %2614 }
 0x2a1   :  { %v1840_v54 = vpop.f32.mrf.mxu1  ;;  %v2618_v1 = vshrl.u32 %v2617_v43, 7 }
 0x2a2   :  { %v2121_v38 = vmax.f32 %v2063_v45, 0.0  ;;  %v1841_v26 = vadd.f32 %v1840_v54, %v4510_v18  ;;  %v2595_v46 = vsel %vm2509_vm1, %v2504_v47, 0.0  ;;  %v2594_v7 = vadd.f32 %v2593_v53, %v2592_v10 }
 0x2a3   :  { %v1842_v61 = vpop.f32.mrf.mxu1  ;;  %v2619_v52 = vsub.s32 0, %v2618_v1 }
 0x2a4   :  { %v2066_v36 = vadd.f32 %v2065_v32, %v1841_v26  ;;  %v2505_v13 = vmul.f32 %v2444_v24, %v2121_v38  ;;  %v2596_v16 = vadd.f32 %v2595_v46, %v2594_v7 }
 0x2a5   :  { %v1845_v25 = vpop.f32.mrf.mxu1  ;;  %v2620_v41 = vrot.slane %v2615_v58, %v2619_v52 }
 0x2a6   :  { %v2122_v37 = vmax.f32 %v2066_v36, 0.0  ;;  %v1846_v0 = vadd.f32 %v1845_v25, %v4511_v56  ;;  %v2597_v51 = vsel %vm2509_vm1, %v2505_v13, 0.0 }
 0x2a7   :  { %v1847_v12 = vpop.f32.mrf.mxu1  ;;  %v2598_v23 = vadd.f32 %v2597_v51, %v2596_v16 }
 0x2a8   :  { %v2506_v35 = vmul.f32 %v2449_v33, %v2122_v37  ;;  %v2071_v63 = vadd.f32 %v3046_v19, %v1846_v0 }
 0x2a9   :  { %v1848_v59 = vpop.f32.mrf.mxu1 }
 0x2aa   :  { %v2123_v31 = vmax.f32 %v2071_v63, 0.0  ;;  %v1849_v11 = vadd.f32 %v1848_v59, %v4512_v55  ;;  %v2599_v8 = vsel %vm2509_vm1, %v2506_v35, 0.0 }
 0x2ab   :  { %v1850_v5 = vpop.f32.mrf.mxu1  ;;  %v2600_v19 = vadd.f32 %v2599_v8, %v2598_v23 }
 0x2ac   :  { %v2507_v49 = vmul.f32 %v2454_v39, %v2123_v31  ;;  %v2074_v27 = vadd.f32 %v3047_v22, %v1849_v11 }
 0x2ae   :  { %v2601_v2 = vsel %vm2509_vm1, %v2507_v49, 0.0  ;;  %v2124_v60 = vmax.f32 %v2074_v27, 0.0 }
 0x2af   :  { %v2602_v48 = vadd.f32 %v2601_v2, %v2600_v19 }
 0x2b0   :  { %v2508_v4 = vmul.f32 %v2459_v15, %v2124_v60 }
 0x2b2   :  { %v2603_v34 = vsel %vm2509_vm1, %v2508_v4, 0.0 }
 0x2b3   :  { %v2604_v3 = vadd.f32 %v2603_v34, %v2602_v48 }
 0x2b5   :  { %v2605_v21 = vrot.slane %v2604_v3, 4 }
 0x2b7   :  { %v2606_v44 = vadd.f32 %v2605_v21, %v2604_v3 }
 0x2b9   :  { %v2607_v57 = vrot.slane %v2606_v44, 2 }
 0x2bb   :  { %v2608_v42 = vadd.f32 %v2607_v57, %v2606_v44 }
 0x2bd   :  { %v2609_v14 = vrot.slane %v2608_v42, 1 }
 0x2bf   :  { %v2610_v22 = vadd.f32 %v2609_v14, %v2608_v42 }
 0x2c1   :  { %v2621_v9 = vadd.f32 %v2620_v41, %v2610_v22 }
 0x2c3   :  { %2623 = vst.msk [vmem:[#allocation3] sm:$0x1] %vm2622_vm2, %v2621_v9 }
 0x2c4   :  { %3188 = shalt.err (!%p3185_p4)
}
 0x2c5   :  { %2633 = dma.vmem_to_hbm [thread:$0]  %s2631_s29, 16, %s4478_s7, [#allocation4]  }
 0x2c6   :  { %3197 = dma.done.wait [#allocation4], 16  }
 0x2c7   :  { %3198 = vsyncadd [#allocation4], 4294967280 }
 0x2c8   :  { %2637 = vsyncpa [#allocation4], 1 }

</bundles_post_ra>
